<compile_context>
chip_gen: v7x
topology: tpu7x:2x2x1
jax: 0.10.0
libtpu: 0.0.40
codegen_flags: <defaults>
</compile_context>

<pallas_src>
import functools

import jax
import jax.numpy as jnp
from jax import lax
from jax.experimental import pallas as pl
from jax.experimental.pallas import tpu as pltpu

EPS = 1e-5                      # nn.GroupNorm default
MXU_DTYPE = jnp.bfloat16        # MXU operand dtype (accumulation stays f32)


def _round_up(x, m):
    return (x + m - 1) // m * m


# ------------------------------- Pallas kernels ------------------------------

def _gn_stats_kernel(x_ref, s_ref):
    """Per-lane sum and sum-of-squares, accumulated over the HW-tile grid axis.

    x_ref block: (1, rt, L); s_ref block: (1, 2, L) f32, resident across the tile axis."""
    @pl.when(pl.program_id(1) == 0)
    def _():
        s_ref[...] = jnp.zeros_like(s_ref)

    x = x_ref[...].astype(jnp.float32)                       # (1, rt, L)
    s = jnp.sum(x, axis=1)                                    # (1, L)
    ss = jnp.sum(x * x, axis=1)                               # (1, L)
    s_ref[...] += jnp.concatenate([s, ss], axis=0)[None, :, :]


def _gn_norm_relu_kernel(x_ref, sc_ref, sh_ref, o_ref):
    """y = relu(x * scale + shift) with per-lane scale/shift; emits o_ref.dtype (bf16)."""
    x = x_ref[...].astype(jnp.float32)                        # (1, rt, L)
    y = x * sc_ref[...] + sh_ref[...]                         # (1, 1, L) broadcast
    o_ref[...] = jnp.maximum(y, 0.0).astype(o_ref.dtype)


def _mm_bias_kernel(a_ref, w_ref, b_ref, o_ref, acc_ref):
    """out = A @ W + bias   (tiled; f32 VMEM accumulator across the K grid axis)."""
    @pl.when(pl.program_id(2) == 0)
    def _():
        acc_ref[...] = jnp.zeros_like(acc_ref)

    acc_ref[...] += jnp.dot(a_ref[...], w_ref[...], preferred_element_type=jnp.float32)

    @pl.when(pl.program_id(2) == pl.num_programs(2) - 1)
    def _():
        o_ref[...] = (acc_ref[...] + b_ref[...]).astype(o_ref.dtype)


def _mm_bias_res_kernel(a_ref, w_ref, b_ref, r_ref, o_ref, acc_ref):
    """out = A @ W + bias + residual (residual streamed bf16, upcast in the epilogue)."""
    @pl.when(pl.program_id(2) == 0)
    def _():
        acc_ref[...] = jnp.zeros_like(acc_ref)

    acc_ref[...] += jnp.dot(a_ref[...], w_ref[...], preferred_element_type=jnp.float32)

    @pl.when(pl.program_id(2) == pl.num_programs(2) - 1)
    def _():
        o_ref[...] = (acc_ref[...] + b_ref[...]
                      + r_ref[...].astype(jnp.float32)).astype(o_ref.dtype)


# --------------------------------- wrappers -----------------------------------

def _pick_row_tile(n_rows, n_lanes, budget_bytes=2 << 20):
    """Largest row tile (multiple of 8 unless full) keeping one f32 block under budget."""
    max_rows = max(budget_bytes // (n_lanes * 4), 8)
    if n_rows <= max_rows:
        return n_rows
    best = 0
    for rt in range(8, max_rows + 1, 8):
        if n_rows % rt == 0:
            best = rt
    return best if best > 0 else n_rows


def group_norm_relu_nhwc(x_nhwc, num_groups, gamma, beta, out_dtype=MXU_DTYPE):
    """GroupNorm + ReLU on NHWC activations (two lane-dense Pallas passes + tiny glue)."""
    N, H, W, C = x_nhwc.shape
    G = num_groups
    Cg = C // G
    HW = H * W

    # Lane-dense view when the channel pattern is 128-periodic; else fall back to (HW, C).
    flat = (128 % C == 0) and ((HW * C) % 128 == 0)
    if flat:
        L, R = 128, (HW * C) // 128
    else:
        L, R = C, HW
    x_view = x_nhwc.reshape(N, R, L)
    rt = _pick_row_tile(R, L)
    T = R // rt

    # Pass 1: per-lane sum / sum^2, single pass, accumulated over HW tiles.
    stats = pl.pallas_call(
        _gn_stats_kernel,
        out_shape=jax.ShapeDtypeStruct((N, 2, L), jnp.float32),
        grid=(N, T),
        in_specs=[pl.BlockSpec((1, rt, L), lambda n, t: (n, t, 0))],
        out_specs=pl.BlockSpec((1, 2, L), lambda n, t: (n, 0, 0)),
        compiler_params=pltpu.CompilerParams(
            dimension_semantics=("parallel", "arbitrary")),
    )(x_view)

    # Tiny glue (fused under jit): lanes -> channels -> groups -> per-channel scale/shift.
    lane_sum, lane_sq = stats[:, 0, :], stats[:, 1, :]        # (N, L)
    if flat:
        ch_sum = lane_sum.reshape(N, L // C, C).sum(axis=1)   # (N, C)
        ch_sq = lane_sq.reshape(N, L // C, C).sum(axis=1)
    else:
        ch_sum, ch_sq = lane_sum, lane_sq
    cnt = float(HW * Cg)
    g_mean = ch_sum.reshape(N, G, Cg).sum(-1) / cnt            # (N, G)
    # NOTE: single-pass E[x^2]-E[x]^2 variance; adequate at bf16-level tolerances.
    g_var = ch_sq.reshape(N, G, Cg).sum(-1) / cnt - g_mean * g_mean
    g_inv = lax.rsqrt(g_var + EPS)
    mean_c = jnp.repeat(g_mean, Cg, axis=1)                    # (N, C)
    inv_c = jnp.repeat(g_inv, Cg, axis=1)
    scale_c = inv_c * gamma[None, :].astype(jnp.float32)
    shift_c = beta[None, :].astype(jnp.float32) - mean_c * scale_c
    if flat:
        scale_l = jnp.tile(scale_c, (1, L // C))               # lane l -> channel l % C
        shift_l = jnp.tile(shift_c, (1, L // C))
    else:
        scale_l, shift_l = scale_c, shift_c

    # Pass 2: normalize + affine + ReLU, lane-dense bf16 output.
    out = pl.pallas_call(
        _gn_norm_relu_kernel,
        out_shape=jax.ShapeDtypeStruct((N, R, L), out_dtype),
        grid=(N, T),
        in_specs=[
            pl.BlockSpec((1, rt, L), lambda n, t: (n, t, 0)),
            pl.BlockSpec((1, 1, L), lambda n, t: (n, 0, 0)),
            pl.BlockSpec((1, 1, L), lambda n, t: (n, 0, 0)),
        ],
        out_specs=pl.BlockSpec((1, rt, L), lambda n, t: (n, t, 0)),
        compiler_params=pltpu.CompilerParams(
            dimension_semantics=("parallel", "parallel")),
    )(x_view, scale_l.reshape(N, 1, L), shift_l.reshape(N, 1, L))
    return out.reshape(N, H, W, C)


def matmul_bias(a, w, bias, residual=None, out_dtype=MXU_DTYPE):
    """(M, K) @ (K, N) + bias [+ residual] via a tiled Pallas MXU kernel.

    Operands are zero-padded so the output lane dim is a multiple of 128 (lane-dense
    stores) and fed to the MXU in bf16 with f32 accumulation.
    """
    M, K = a.shape
    K2, Nout = w.shape
    assert K2 == K

    # Double-buffered bf16 working set stays <~12 MiB: safe on v7x's 64 MiB VMEM while
    # large enough tiles (up to 512/512/1024) to sit near the HBM roofline on v5e/v6e.
    if M <= 512:
        tm = _round_up(M, 8)
        Mpad = tm
    else:
        tm = 512
        Mpad = _round_up(M, tm)
    Npad = _round_up(Nout, 128)
    if Npad <= 512:
        tn = Npad
    elif Npad % 512 == 0:
        tn = 512
    elif Npad % 256 == 0:
        tn = 256
    else:
        tn = 128
    if K <= 2048:
        Kpad = _round_up(K, 128)
        tk = Kpad
    else:
        tk = 1024
        Kpad = _round_up(K, tk)

    a_p = jnp.pad(a.astype(MXU_DTYPE), ((0, Mpad - M), (0, Kpad - K)))
    w_p = jnp.pad(w.astype(MXU_DTYPE), ((0, Kpad - K), (0, Npad - Nout)))
    b_p = jnp.pad(bias.astype(jnp.float32).reshape(1, Nout), ((0, 0), (0, Npad - Nout)))

    grid = (Mpad // tm, Npad // tn, Kpad // tk)
    in_specs = [
        pl.BlockSpec((tm, tk), lambda i, j, k: (i, k)),
        pl.BlockSpec((tk, tn), lambda i, j, k: (k, j)),
        pl.BlockSpec((1, tn), lambda i, j, k: (0, j)),
    ]
    operands = [a_p, w_p, b_p]
    if residual is None:
        kernel = _mm_bias_kernel
    else:
        kernel = _mm_bias_res_kernel
        r_p = jnp.pad(residual.astype(MXU_DTYPE), ((0, Mpad - M), (0, Npad - Nout)))
        in_specs.append(pl.BlockSpec((tm, tn), lambda i, j, k: (i, j)))
        operands.append(r_p)

    out = pl.pallas_call(
        kernel,
        out_shape=jax.ShapeDtypeStruct((Mpad, Npad), out_dtype),
        grid_spec=pltpu.PrefetchScalarGridSpec(
            num_scalar_prefetch=0,
            grid=grid,
            in_specs=in_specs,
            out_specs=pl.BlockSpec((tm, tn), lambda i, j, k: (i, j)),
            scratch_shapes=[pltpu.VMEM((tm, tn), jnp.float32)],
        ),
        compiler_params=pltpu.CompilerParams(
            dimension_semantics=("parallel", "parallel", "arbitrary"),
            vmem_limit_bytes=32 * 1024 * 1024),
    )(*operands)
    return out[:M, :Nout]


def _im2col_nhwc(x_nhwc, K, stride, pad):
    """(N, H, W, C) -> (N*Ho*Wo, K*K*C) patches; column order (kh, kw, c)."""
    N, H, W, C = x_nhwc.shape
    Ho = (H + 2 * pad - K) // stride + 1
    Wo = (W + 2 * pad - K) // stride + 1
    xp = jnp.pad(x_nhwc, ((0, 0), (pad, pad), (pad, pad), (0, 0)))
    cols = []
    for kh in range(K):
        for kw in range(K):
            cols.append(xp[:, kh:kh + (Ho - 1) * stride + 1:stride,
                           kw:kw + (Wo - 1) * stride + 1:stride, :])
    patches = jnp.concatenate(cols, axis=-1)                   # (N, Ho, Wo, K*K*C)
    return patches.reshape(N * Ho * Wo, K * K * C), Ho, Wo


def _weight_kkc(w_oikk):
    """PyTorch (O, I, K, K) conv weight -> (K*K*I, O) matching (kh, kw, c) patch order."""
    O, I, K, _ = w_oikk.shape
    return w_oikk.transpose(2, 3, 1, 0).reshape(K * K * I, O)


def residual_block_forward(x_nchw, params, *, stride, num_groups):
    """Matches ResidualBlock.forward.  Note: the projection is applied to the
    normalized+activated input (PyTorch overwrites `inputs` before the `if`)."""
    N, C, H, W = x_nchw.shape
    conv1_w = params["conv1_w"]
    O, _, K, _ = conv1_w.shape
    pad = K // 2

    x = jnp.transpose(x_nchw, (0, 2, 3, 1))                    # NHWC once, at entry

    # norm1 + act1 (bf16 output feeds im2col / MXU directly)
    h = group_norm_relu_nhwc(x, num_groups, params["gn1_g"], params["gn1_b"])

    # conv1: im2col + MXU matmul; bf16 output (GN2 re-normalizes in f32 anyway).
    patches1, Ho, Wo = _im2col_nhwc(h, K, stride, pad)         # (N*Ho*Wo, K*K*C) bf16
    conv1_out = matmul_bias(patches1, _weight_kkc(conv1_w), params["conv1_b"],
                            out_dtype=MXU_DTYPE)               # (N*Ho*Wo, O) bf16

    # Shortcut: 1x1 stride-s projection of the normalized input as its own small matmul
    # (fusing it into conv1 would cost K*K*C MACs per output column instead of C).
    if params.get("proj_w") is not None:
        centers = h[:, ::stride, ::stride, :].reshape(N * Ho * Wo, C)
        shortcut = matmul_bias(centers, params["proj_w"].reshape(O, C).T,
                               jnp.zeros((O,), jnp.float32), out_dtype=MXU_DTYPE)
    else:
        assert stride == 1 and C == O, \
            "identity shortcut requires stride == 1 and in_channels == out_channels"
        shortcut = x.reshape(N * H * W, C).astype(MXU_DTYPE)

    # norm2 + act2
    h2 = group_norm_relu_nhwc(conv1_out.reshape(N, Ho, Wo, O), num_groups,
                              params["gn2_g"], params["gn2_b"])

    # conv2 (stride 1) + residual add fused into the matmul epilogue
    patches2, Ho2, Wo2 = _im2col_nhwc(h2, K, 1, pad)
    out_flat = matmul_bias(patches2, _weight_kkc(params["conv2_w"]),
                           params["conv2_b"], residual=shortcut,
                           out_dtype=jnp.float32)
    out = out_flat.reshape(N, Ho2, Wo2, O)
    return jnp.transpose(out, (0, 3, 1, 2))                    # back to NCHW once, at exit


# ------------------------- deterministic init / reference ---------------------

def init_params(key, cin, cout, k):
    def kaiming(kk, shape):
        fan_in = shape[1] * shape[2] * shape[3]
        std = jnp.sqrt(2.0 / fan_in)                           # kaiming_normal_, relu gain
        return jax.random.normal(kk, shape, jnp.float32) * std

    k1, k2, k3, k4, k5 = jax.random.split(key, 5)
    return dict(
        gn1_g=jnp.ones((cin,), jnp.float32), gn1_b=jnp.zeros((cin,), jnp.float32),
        conv1_w=kaiming(k1, (cout, cin, k, k)),
        conv1_b=jax.random.normal(k2, (cout,), jnp.float32) * 0.01,
        gn2_g=jnp.ones((cout,), jnp.float32), gn2_b=jnp.zeros((cout,), jnp.float32),
        conv2_w=kaiming(k3, (cout, cout, k, k)),
        conv2_b=jax.random.normal(k4, (cout,), jnp.float32) * 0.01,
        proj_w=kaiming(k5, (cout, cin, 1, 1)),
    )


def _ref_forward(x, params, *, stride, num_groups):
    def gn(z, gamma, beta):
        n, c, h, w = z.shape
        zr = z.reshape(n, num_groups, (c // num_groups) * h * w)
        m = zr.mean(-1, keepdims=True)
        v = ((zr - m) ** 2).mean(-1, keepdims=True)
        zn = ((zr - m) / jnp.sqrt(v + EPS)).reshape(n, c, h, w)
        return zn * gamma[None, :, None, None] + beta[None, :, None, None]

    def conv(z, w, b, s, p):
        out = lax.conv_general_dilated(z, w, (s, s), [(p, p), (p, p)],
                                       dimension_numbers=('NCHW', 'OIHW', 'NCHW'))
        return out if b is None else out + b[None, :, None, None]

    pad = params["conv1_w"].shape[-1] // 2
    h = jax.nn.relu(gn(x, params["gn1_g"], params["gn1_b"]))
    sc = (conv(h, params["proj_w"], None, stride, 0)
          if params.get("proj_w") is not None else x)
    h = conv(h, params["conv1_w"], params["conv1_b"], stride, pad)
    h = jax.nn.relu(gn(h, params["gn2_g"], params["gn2_b"]))
    h = conv(h, params["conv2_w"], params["conv2_b"], 1, pad)
    return h + sc


# ------------------------------------ main -------------------------------------

if __name__ == "__main__":
    # ResidualBlock(in_channels=4, out_channels=8, kernel_size=3, stride=2,
    #               projection=True, num_groups=2) on a (2, 4, 16, 16) input.
    key = jax.random.PRNGKey(0)
    kx, kp = jax.random.split(key)
    x = jax.random.normal(kx, (2, 4, 16, 16), jnp.float32)
    params = init_params(kp, cin=4, cout=8, k=3)

    fwd = jax.jit(functools.partial(residual_block_forward, stride=2, num_groups=2))
    ref_fn = jax.jit(functools.partial(_ref_forward, stride=2, num_groups=2))

    out = jax.block_until_ready(fwd(x, params))
    ref = jax.block_until_ready(ref_fn(x, params))

    assert out.shape == ref.shape == (2, 8, 8, 8)
    # bf16 MXU operands / bf16 intermediates (f32 accumulation) -> compare against the
    # f32 reference with a correspondingly loosened tolerance.
    max_err = float(jnp.max(jnp.abs(out - ref)))
    assert jnp.allclose(out, ref, rtol=4e-2, atol=6e-2), f"max abs err {max_err}"

    print("KERNEL_OK")
</pallas_src>

<mosaic_0001>
module attributes {stable_mosaic.version = 11 : i64} {
  func.func @_gn_stats_kernel(%arg0: i32, %arg1: i32, %arg2: memref<1x8x128xf32, #tpu.memory_space<vmem>>, %arg3: memref<1x2x128xf32, #tpu.memory_space<vmem>>) attributes {dimension_semantics = [#tpu.dimension_semantics<parallel>, #tpu.dimension_semantics<arbitrary>], iteration_bounds = array<i64: 2, 1>, scalar_prefetch = 0 : i64, scratch_operands = 0 : i64, tpu.core_type = #tpu.core_type<tc>, window_params = [{transform_indices = @transform_0, window_bounds = array<i64: 1, 8, 128>}, {transform_indices = @transform_1, window_bounds = array<i64: 1, 2, 128>}]} {
    %c0_i32 = arith.constant 0 : i32
    %0 = arith.cmpi eq, %arg1, %c0_i32 : i32
    %1 = arith.extui %0 : i1 to i32
    %c0_i32_0 = arith.constant 0 : i32
    %2 = arith.cmpi ne, %1, %c0_i32_0 : i32
    scf.if %2 {
      %cst_10 = arith.constant 0.000000e+00 : f32
      %12 = vector.broadcast %cst_10 : f32 to vector<1x2x128xf32>
      %c0_11 = arith.constant 0 : index
      %c0_12 = arith.constant 0 : index
      %c0_13 = arith.constant 0 : index
      %13 = vector.load %arg3[%c0_11, %c0_12, %c0_13] : memref<1x2x128xf32, #tpu.memory_space<vmem>>, vector<1x2x128xf32>
      tpu.vector_store %arg3[%c0_11, %c0_12, %c0_13], %12 {strides = array<i32>} : memref<1x2x128xf32, #tpu.memory_space<vmem>>, vector<1x2x128xf32>,
    } else {
    }
    %c0 = arith.constant 0 : index
    %c0_1 = arith.constant 0 : index
    %c0_2 = arith.constant 0 : index
    %3 = vector.load %arg2[%c0, %c0_1, %c0_2] : memref<1x8x128xf32, #tpu.memory_space<vmem>>, vector<1x8x128xf32>
    %cst = arith.constant dense<0.000000e+00> : vector<1x128xf32>
    %4 = vector.multi_reduction <add>, %3, %cst [1] : vector<1x8x128xf32> to vector<1x128xf32>
    %5 = arith.mulf %3, %3 : vector<1x8x128xf32>
    %cst_3 = arith.constant dense<0.000000e+00> : vector<1x128xf32>
    %6 = vector.multi_reduction <add>, %5, %cst_3 [1] : vector<1x8x128xf32> to vector<1x128xf32>
    %c0_4 = arith.constant 0 : index
    %c0_5 = arith.constant 0 : index
    %c0_6 = arith.constant 0 : index
    %7 = vector.load %arg3[%c0_4, %c0_5, %c0_6] : memref<1x2x128xf32, #tpu.memory_space<vmem>>, vector<1x2x128xf32>
    %8 = tpu.concatenate %4, %6 in 0 : vector<1x128xf32>, vector<1x128xf32> -> vector<2x128xf32>
    %9 = vector.shape_cast %8 : vector<2x128xf32> to vector<1x2x128xf32>
    %10 = arith.addf %7, %9 : vector<1x2x128xf32>
    %c0_7 = arith.constant 0 : index
    %c0_8 = arith.constant 0 : index
    %c0_9 = arith.constant 0 : index
    %11 = vector.load %arg3[%c0_7, %c0_8, %c0_9] : memref<1x2x128xf32, #tpu.memory_space<vmem>>, vector<1x2x128xf32>
    tpu.vector_store %arg3[%c0_7, %c0_8, %c0_9], %10 {strides = array<i32>} : memref<1x2x128xf32, #tpu.memory_space<vmem>>, vector<1x2x128xf32>,
    return
  }
  func.func @transform_0(%arg0: i32, %arg1: i32) -> (i32, i32, i32) {
    %c0_i32 = arith.constant 0 : i32
    %c0_i32_0 = arith.constant 0 : i32
    return %arg0, %arg1, %c0_i32 : i32, i32, i32
  }
  func.func @transform_1(%arg0: i32, %arg1: i32) -> (i32, i32, i32) {
    %c0_i32 = arith.constant 0 : i32
    %c0_i32_0 = arith.constant 0 : i32
    %c0_i32_1 = arith.constant 0 : i32
    return %arg0, %c0_i32, %c0_i32_0 : i32, i32, i32
  }
}

module attributes {stable_mosaic.version = 11 : i64} {
  func.func @_gn_norm_relu_kernel(%arg0: i32, %arg1: i32, %arg2: memref<1x8x128xf32, #tpu.memory_space<vmem>>, %arg3: memref<1x1x128xf32, #tpu.memory_space<vmem>>, %arg4: memref<1x1x128xf32, #tpu.memory_space<vmem>>, %arg5: memref<1x8x128xbf16, #tpu.memory_space<vmem>>) attributes {dimension_semantics = [#tpu.dimension_semantics<parallel>, #tpu.dimension_semantics<parallel>], iteration_bounds = array<i64: 2, 1>, scalar_prefetch = 0 : i64, scratch_operands = 0 : i64, tpu.core_type = #tpu.core_type<tc>, window_params = [{transform_indices = @transform_0, window_bounds = array<i64: 1, 8, 128>}, {transform_indices = @transform_1, window_bounds = array<i64: 1, 1, 128>}, {transform_indices = @transform_2, window_bounds = array<i64: 1, 1, 128>}, {transform_indices = @transform_3, window_bounds = array<i64: 1, 8, 128>}]} {
    %c0 = arith.constant 0 : index
    %c0_0 = arith.constant 0 : index
    %c0_1 = arith.constant 0 : index
    %0 = vector.load %arg2[%c0, %c0_0, %c0_1] : memref<1x8x128xf32, #tpu.memory_space<vmem>>, vector<1x8x128xf32>
    %c0_2 = arith.constant 0 : index
    %c0_3 = arith.constant 0 : index
    %c0_4 = arith.constant 0 : index
    %1 = vector.load %arg3[%c0_2, %c0_3, %c0_4] : memref<1x1x128xf32, #tpu.memory_space<vmem>>, vector<1x1x128xf32>
    %2 = vector.broadcast %1 : vector<1x1x128xf32> to vector<1x8x128xf32>
    %3 = arith.mulf %0, %2 : vector<1x8x128xf32>
    %c0_5 = arith.constant 0 : index
    %c0_6 = arith.constant 0 : index
    %c0_7 = arith.constant 0 : index
    %4 = vector.load %arg4[%c0_5, %c0_6, %c0_7] : memref<1x1x128xf32, #tpu.memory_space<vmem>>, vector<1x1x128xf32>
    %5 = vector.broadcast %4 : vector<1x1x128xf32> to vector<1x8x128xf32>
    %6 = arith.addf %3, %5 : vector<1x8x128xf32>
    %cst = arith.constant 0.000000e+00 : f32
    %7 = vector.broadcast %cst : f32 to vector<1x8x128xf32>
    %8 = arith.maximumf %6, %7 : vector<1x8x128xf32>
    %9 = arith.truncf %8 : vector<1x8x128xf32> to vector<1x8x128xbf16>
    %c0_8 = arith.constant 0 : index
    %c0_9 = arith.constant 0 : index
    %c0_10 = arith.constant 0 : index
    %10 = vector.load %arg5[%c0_8, %c0_9, %c0_10] : memref<1x8x128xbf16, #tpu.memory_space<vmem>>, vector<1x8x128xbf16>
    tpu.vector_store %arg5[%c0_8, %c0_9, %c0_10], %9 {strides = array<i32>} : memref<1x8x128xbf16, #tpu.memory_space<vmem>>, vector<1x8x128xbf16>,
    return
  }
  func.func @transform_0(%arg0: i32, %arg1: i32) -> (i32, i32, i32) {
    %c0_i32 = arith.constant 0 : i32
    %c0_i32_0 = arith.constant 0 : i32
    return %arg0, %arg1, %c0_i32 : i32, i32, i32
  }
  func.func @transform_1(%arg0: i32, %arg1: i32) -> (i32, i32, i32) {
    %c0_i32 = arith.constant 0 : i32
    %c0_i32_0 = arith.constant 0 : i32
    %c0_i32_1 = arith.constant 0 : i32
    return %arg0, %c0_i32, %c0_i32_0 : i32, i32, i32
  }
  func.func @transform_2(%arg0: i32, %arg1: i32) -> (i32, i32, i32) {
    %c0_i32 = arith.constant 0 : i32
    %c0_i32_0 = arith.constant 0 : i32
    %c0_i32_1 = arith.constant 0 : i32
    return %arg0, %c0_i32, %c0_i32_0 : i32, i32, i32
  }
  func.func @transform_3(%arg0: i32, %arg1: i32) -> (i32, i32, i32) {
    %c0_i32 = arith.constant 0 : i32
    %c0_i32_0 = arith.constant 0 : i32
    return %arg0, %arg1, %c0_i32 : i32, i32, i32
  }
}

module attributes {stable_mosaic.version = 11 : i64} {
  func.func @_mm_bias_kernel(%arg0: i32, %arg1: i32, %arg2: i32, %arg3: memref<128x128xbf16, #tpu.memory_space<vmem>>, %arg4: memref<128x128xbf16, #tpu.memory_space<vmem>>, %arg5: memref<1x128xf32, #tpu.memory_space<vmem>>, %arg6: memref<128x128xbf16, #tpu.memory_space<vmem>>, %arg7: memref<128x128xf32, #tpu.memory_space<vmem>>) attributes {dimension_semantics = [#tpu.dimension_semantics<parallel>, #tpu.dimension_semantics<parallel>, #tpu.dimension_semantics<arbitrary>], iteration_bounds = array<i64: 1, 1, 1>, scalar_prefetch = 0 : i64, scratch_operands = 1 : i64, tpu.core_type = #tpu.core_type<tc>, window_params = [{transform_indices = @transform_0, window_bounds = array<i64: 128, 128>}, {transform_indices = @transform_1, window_bounds = array<i64: 128, 128>}, {transform_indices = @transform_2, window_bounds = array<i64: 1, 128>}, {transform_indices = @transform_3, window_bounds = array<i64: 128, 128>}]} {
    %c0_i32 = arith.constant 0 : i32
    %0 = arith.cmpi eq, %arg2, %c0_i32 : i32
    %1 = arith.extui %0 : i1 to i32
    %c0_i32_0 = arith.constant 0 : i32
    %2 = arith.cmpi ne, %1, %c0_i32_0 : i32
    scf.if %2 {
      %cst_10 = arith.constant 0.000000e+00 : f32
      %12 = vector.broadcast %cst_10 : f32 to vector<128x128xf32>
      %c0_11 = arith.constant 0 : index
      %c0_12 = arith.constant 0 : index
      %13 = vector.load %arg7[%c0_11, %c0_12] : memref<128x128xf32, #tpu.memory_space<vmem>>, vector<128x128xf32>
      tpu.vector_store %arg7[%c0_11, %c0_12], %12 {strides = array<i32>} : memref<128x128xf32, #tpu.memory_space<vmem>>, vector<128x128xf32>,
    } else {
    }
    %c0 = arith.constant 0 : index
    %c0_1 = arith.constant 0 : index
    %3 = vector.load %arg7[%c0, %c0_1] : memref<128x128xf32, #tpu.memory_space<vmem>>, vector<128x128xf32>
    %c0_2 = arith.constant 0 : index
    %c0_3 = arith.constant 0 : index
    %4 = vector.load %arg3[%c0_2, %c0_3] : memref<128x128xbf16, #tpu.memory_space<vmem>>, vector<128x128xbf16>
    %c0_4 = arith.constant 0 : index
    %c0_5 = arith.constant 0 : index
    %5 = vector.load %arg4[%c0_4, %c0_5] : memref<128x128xbf16, #tpu.memory_space<vmem>>, vector<128x128xbf16>
    %cst = arith.constant dense<0.000000e+00> : vector<128x128xf32>
    %6 = tpu.matmul %4, %5, %cst {dimension_numbers = #tpu.dot_dimension_numbers<[1], [0], [0], [1], [0, 0, 1, 1], [], []>} : vector<128x128xbf16>, vector<128x128xbf16>, vector<128x128xf32> -> vector<128x128xf32>
    %7 = arith.addf %3, %6 : vector<128x128xf32>
    %c0_6 = arith.constant 0 : index
    %c0_7 = arith.constant 0 : index
    %8 = vector.load %arg7[%c0_6, %c0_7] : memref<128x128xf32, #tpu.memory_space<vmem>>, vector<128x128xf32>
    tpu.vector_store %arg7[%c0_6, %c0_7], %7 {strides = array<i32>} : memref<128x128xf32, #tpu.memory_space<vmem>>, vector<128x128xf32>,
    %c0_i32_8 = arith.constant 0 : i32
    %9 = arith.cmpi eq, %arg2, %c0_i32_8 : i32
    %10 = arith.extui %9 : i1 to i32
    %c0_i32_9 = arith.constant 0 : i32
    %11 = arith.cmpi ne, %10, %c0_i32_9 : i32
    scf.if %11 {
      %c0_10 = arith.constant 0 : index
      %c0_11 = arith.constant 0 : index
      %12 = vector.load %arg7[%c0_10, %c0_11] : memref<128x128xf32, #tpu.memory_space<vmem>>, vector<128x128xf32>
      %c0_12 = arith.constant 0 : index
      %c0_13 = arith.constant 0 : index
      %13 = vector.load %arg5[%c0_12, %c0_13] : memref<1x128xf32, #tpu.memory_space<vmem>>, vector<1x128xf32>
      %14 = vector.broadcast %13 : vector<1x128xf32> to vector<128x128xf32>
      %15 = arith.addf %12, %14 : vector<128x128xf32>
      %16 = arith.truncf %15 : vector<128x128xf32> to vector<128x128xbf16>
      %c0_14 = arith.constant 0 : index
      %c0_15 = arith.constant 0 : index
      %17 = vector.load %arg6[%c0_14, %c0_15] : memref<128x128xbf16, #tpu.memory_space<vmem>>, vector<128x128xbf16>
      tpu.vector_store %arg6[%c0_14, %c0_15], %16 {strides = array<i32>} : memref<128x128xbf16, #tpu.memory_space<vmem>>, vector<128x128xbf16>,
    } else {
    }
    return
  }
  func.func @transform_0(%arg0: i32, %arg1: i32, %arg2: i32) -> (i32, i32) {
    %c0_i32 = arith.constant 0 : i32
    return %arg0, %arg2 : i32, i32
  }
  func.func @transform_1(%arg0: i32, %arg1: i32, %arg2: i32) -> (i32, i32) {
    %c0_i32 = arith.constant 0 : i32
    return %arg2, %arg1 : i32, i32
  }
  func.func @transform_2(%arg0: i32, %arg1: i32, %arg2: i32) -> (i32, i32) {
    %c0_i32 = arith.constant 0 : i32
    %c0_i32_0 = arith.constant 0 : i32
    return %c0_i32, %arg1 : i32, i32
  }
  func.func @transform_3(%arg0: i32, %arg1: i32, %arg2: i32) -> (i32, i32) {
    %c0_i32 = arith.constant 0 : i32
    return %arg0, %arg1 : i32, i32
  }
}

module attributes {stable_mosaic.version = 11 : i64} {
  func.func @_gn_stats_kernel(%arg0: i32, %arg1: i32, %arg2: memref<1x4x128xbf16, #tpu.memory_space<vmem>>, %arg3: memref<1x2x128xf32, #tpu.memory_space<vmem>>) attributes {dimension_semantics = [#tpu.dimension_semantics<parallel>, #tpu.dimension_semantics<arbitrary>], iteration_bounds = array<i64: 2, 1>, scalar_prefetch = 0 : i64, scratch_operands = 0 : i64, tpu.core_type = #tpu.core_type<tc>, window_params = [{transform_indices = @transform_0, window_bounds = array<i64: 1, 4, 128>}, {transform_indices = @transform_1, window_bounds = array<i64: 1, 2, 128>}]} {
    %c0_i32 = arith.constant 0 : i32
    %0 = arith.cmpi eq, %arg1, %c0_i32 : i32
    %1 = arith.extui %0 : i1 to i32
    %c0_i32_0 = arith.constant 0 : i32
    %2 = arith.cmpi ne, %1, %c0_i32_0 : i32
    scf.if %2 {
      %cst_10 = arith.constant 0.000000e+00 : f32
      %13 = vector.broadcast %cst_10 : f32 to vector<1x2x128xf32>
      %c0_11 = arith.constant 0 : index
      %c0_12 = arith.constant 0 : index
      %c0_13 = arith.constant 0 : index
      %14 = vector.load %arg3[%c0_11, %c0_12, %c0_13] : memref<1x2x128xf32, #tpu.memory_space<vmem>>, vector<1x2x128xf32>
      tpu.vector_store %arg3[%c0_11, %c0_12, %c0_13], %13 {strides = array<i32>} : memref<1x2x128xf32, #tpu.memory_space<vmem>>, vector<1x2x128xf32>,
    } else {
    }
    %c0 = arith.constant 0 : index
    %c0_1 = arith.constant 0 : index
    %c0_2 = arith.constant 0 : index
    %3 = vector.load %arg2[%c0, %c0_1, %c0_2] : memref<1x4x128xbf16, #tpu.memory_space<vmem>>, vector<1x4x128xbf16>
    %4 = arith.extf %3 : vector<1x4x128xbf16> to vector<1x4x128xf32>
    %cst = arith.constant dense<0.000000e+00> : vector<1x128xf32>
    %5 = vector.multi_reduction <add>, %4, %cst [1] : vector<1x4x128xf32> to vector<1x128xf32>
    %6 = arith.mulf %4, %4 : vector<1x4x128xf32>
    %cst_3 = arith.constant dense<0.000000e+00> : vector<1x128xf32>
    %7 = vector.multi_reduction <add>, %6, %cst_3 [1] : vector<1x4x128xf32> to vector<1x128xf32>
    %c0_4 = arith.constant 0 : index
    %c0_5 = arith.constant 0 : index
    %c0_6 = arith.constant 0 : index
    %8 = vector.load %arg3[%c0_4, %c0_5, %c0_6] : memref<1x2x128xf32, #tpu.memory_space<vmem>>, vector<1x2x128xf32>
    %9 = tpu.concatenate %5, %7 in 0 : vector<1x128xf32>, vector<1x128xf32> -> vector<2x128xf32>
    %10 = vector.shape_cast %9 : vector<2x128xf32> to vector<1x2x128xf32>
    %11 = arith.addf %8, %10 : vector<1x2x128xf32>
    %c0_7 = arith.constant 0 : index
    %c0_8 = arith.constant 0 : index
    %c0_9 = arith.constant 0 : index
    %12 = vector.load %arg3[%c0_7, %c0_8, %c0_9] : memref<1x2x128xf32, #tpu.memory_space<vmem>>, vector<1x2x128xf32>
    tpu.vector_store %arg3[%c0_7, %c0_8, %c0_9], %11 {strides = array<i32>} : memref<1x2x128xf32, #tpu.memory_space<vmem>>, vector<1x2x128xf32>,
    return
  }
  func.func @transform_0(%arg0: i32, %arg1: i32) -> (i32, i32, i32) {
    %c0_i32 = arith.constant 0 : i32
    %c0_i32_0 = arith.constant 0 : i32
    return %arg0, %arg1, %c0_i32 : i32, i32, i32
  }
  func.func @transform_1(%arg0: i32, %arg1: i32) -> (i32, i32, i32) {
    %c0_i32 = arith.constant 0 : i32
    %c0_i32_0 = arith.constant 0 : i32
    %c0_i32_1 = arith.constant 0 : i32
    return %arg0, %c0_i32, %c0_i32_0 : i32, i32, i32
  }
}

module attributes {stable_mosaic.version = 11 : i64} {
  func.func @_gn_norm_relu_kernel(%arg0: i32, %arg1: i32, %arg2: memref<1x4x128xbf16, #tpu.memory_space<vmem>>, %arg3: memref<1x1x128xf32, #tpu.memory_space<vmem>>, %arg4: memref<1x1x128xf32, #tpu.memory_space<vmem>>, %arg5: memref<1x4x128xbf16, #tpu.memory_space<vmem>>) attributes {dimension_semantics = [#tpu.dimension_semantics<parallel>, #tpu.dimension_semantics<parallel>], iteration_bounds = array<i64: 2, 1>, scalar_prefetch = 0 : i64, scratch_operands = 0 : i64, tpu.core_type = #tpu.core_type<tc>, window_params = [{transform_indices = @transform_0, window_bounds = array<i64: 1, 4, 128>}, {transform_indices = @transform_1, window_bounds = array<i64: 1, 1, 128>}, {transform_indices = @transform_2, window_bounds = array<i64: 1, 1, 128>}, {transform_indices = @transform_3, window_bounds = array<i64: 1, 4, 128>}]} {
    %c0 = arith.constant 0 : index
    %c0_0 = arith.constant 0 : index
    %c0_1 = arith.constant 0 : index
    %0 = vector.load %arg2[%c0, %c0_0, %c0_1] : memref<1x4x128xbf16, #tpu.memory_space<vmem>>, vector<1x4x128xbf16>
    %1 = arith.extf %0 : vector<1x4x128xbf16> to vector<1x4x128xf32>
    %c0_2 = arith.constant 0 : index
    %c0_3 = arith.constant 0 : index
    %c0_4 = arith.constant 0 : index
    %2 = vector.load %arg3[%c0_2, %c0_3, %c0_4] : memref<1x1x128xf32, #tpu.memory_space<vmem>>, vector<1x1x128xf32>
    %3 = vector.broadcast %2 : vector<1x1x128xf32> to vector<1x4x128xf32>
    %4 = arith.mulf %1, %3 : vector<1x4x128xf32>
    %c0_5 = arith.constant 0 : index
    %c0_6 = arith.constant 0 : index
    %c0_7 = arith.constant 0 : index
    %5 = vector.load %arg4[%c0_5, %c0_6, %c0_7] : memref<1x1x128xf32, #tpu.memory_space<vmem>>, vector<1x1x128xf32>
    %6 = vector.broadcast %5 : vector<1x1x128xf32> to vector<1x4x128xf32>
    %7 = arith.addf %4, %6 : vector<1x4x128xf32>
    %cst = arith.constant 0.000000e+00 : f32
    %8 = vector.broadcast %cst : f32 to vector<1x4x128xf32>
    %9 = arith.maximumf %7, %8 : vector<1x4x128xf32>
    %10 = arith.truncf %9 : vector<1x4x128xf32> to vector<1x4x128xbf16>
    %c0_8 = arith.constant 0 : index
    %c0_9 = arith.constant 0 : index
    %c0_10 = arith.constant 0 : index
    %11 = vector.load %arg5[%c0_8, %c0_9, %c0_10] : memref<1x4x128xbf16, #tpu.memory_space<vmem>>, vector<1x4x128xbf16>
    tpu.vector_store %arg5[%c0_8, %c0_9, %c0_10], %10 {strides = array<i32>} : memref<1x4x128xbf16, #tpu.memory_space<vmem>>, vector<1x4x128xbf16>,
    return
  }
  func.func @transform_0(%arg0: i32, %arg1: i32) -> (i32, i32, i32) {
    %c0_i32 = arith.constant 0 : i32
    %c0_i32_0 = arith.constant 0 : i32
    return %arg0, %arg1, %c0_i32 : i32, i32, i32
  }
  func.func @transform_1(%arg0: i32, %arg1: i32) -> (i32, i32, i32) {
    %c0_i32 = arith.constant 0 : i32
    %c0_i32_0 = arith.constant 0 : i32
    %c0_i32_1 = arith.constant 0 : i32
    return %arg0, %c0_i32, %c0_i32_0 : i32, i32, i32
  }
  func.func @transform_2(%arg0: i32, %arg1: i32) -> (i32, i32, i32) {
    %c0_i32 = arith.constant 0 : i32
    %c0_i32_0 = arith.constant 0 : i32
    %c0_i32_1 = arith.constant 0 : i32
    return %arg0, %c0_i32, %c0_i32_0 : i32, i32, i32
  }
  func.func @transform_3(%arg0: i32, %arg1: i32) -> (i32, i32, i32) {
    %c0_i32 = arith.constant 0 : i32
    %c0_i32_0 = arith.constant 0 : i32
    return %arg0, %arg1, %c0_i32 : i32, i32, i32
  }
}

module attributes {stable_mosaic.version = 11 : i64} {
  func.func @_mm_bias_res_kernel(%arg0: i32, %arg1: i32, %arg2: i32, %arg3: memref<128x128xbf16, #tpu.memory_space<vmem>>, %arg4: memref<128x128xbf16, #tpu.memory_space<vmem>>, %arg5: memref<1x128xf32, #tpu.memory_space<vmem>>, %arg6: memref<128x128xbf16, #tpu.memory_space<vmem>>, %arg7: memref<128x128xf32, #tpu.memory_space<vmem>>, %arg8: memref<128x128xf32, #tpu.memory_space<vmem>>) attributes {dimension_semantics = [#tpu.dimension_semantics<parallel>, #tpu.dimension_semantics<parallel>, #tpu.dimension_semantics<arbitrary>], iteration_bounds = array<i64: 1, 1, 1>, scalar_prefetch = 0 : i64, scratch_operands = 1 : i64, tpu.core_type = #tpu.core_type<tc>, window_params = [{transform_indices = @transform_0, window_bounds = array<i64: 128, 128>}, {transform_indices = @transform_1, window_bounds = array<i64: 128, 128>}, {transform_indices = @transform_2, window_bounds = array<i64: 1, 128>}, {transform_indices = @transform_3, window_bounds = array<i64: 128, 128>}, {transform_indices = @transform_4, window_bounds = array<i64: 128, 128>}]} {
    %c0_i32 = arith.constant 0 : i32
    %0 = arith.cmpi eq, %arg2, %c0_i32 : i32
    %1 = arith.extui %0 : i1 to i32
    %c0_i32_0 = arith.constant 0 : i32
    %2 = arith.cmpi ne, %1, %c0_i32_0 : i32
    scf.if %2 {
      %cst_10 = arith.constant 0.000000e+00 : f32
      %12 = vector.broadcast %cst_10 : f32 to vector<128x128xf32>
      %c0_11 = arith.constant 0 : index
      %c0_12 = arith.constant 0 : index
      %13 = vector.load %arg8[%c0_11, %c0_12] : memref<128x128xf32, #tpu.memory_space<vmem>>, vector<128x128xf32>
      tpu.vector_store %arg8[%c0_11, %c0_12], %12 {strides = array<i32>} : memref<128x128xf32, #tpu.memory_space<vmem>>, vector<128x128xf32>,
    } else {
    }
    %c0 = arith.constant 0 : index
    %c0_1 = arith.constant 0 : index
    %3 = vector.load %arg8[%c0, %c0_1] : memref<128x128xf32, #tpu.memory_space<vmem>>, vector<128x128xf32>
    %c0_2 = arith.constant 0 : index
    %c0_3 = arith.constant 0 : index
    %4 = vector.load %arg3[%c0_2, %c0_3] : memref<128x128xbf16, #tpu.memory_space<vmem>>, vector<128x128xbf16>
    %c0_4 = arith.constant 0 : index
    %c0_5 = arith.constant 0 : index
    %5 = vector.load %arg4[%c0_4, %c0_5] : memref<128x128xbf16, #tpu.memory_space<vmem>>, vector<128x128xbf16>
    %cst = arith.constant dense<0.000000e+00> : vector<128x128xf32>
    %6 = tpu.matmul %4, %5, %cst {dimension_numbers = #tpu.dot_dimension_numbers<[1], [0], [0], [1], [0, 0, 1, 1], [], []>} : vector<128x128xbf16>, vector<128x128xbf16>, vector<128x128xf32> -> vector<128x128xf32>
    %7 = arith.addf %3, %6 : vector<128x128xf32>
    %c0_6 = arith.constant 0 : index
    %c0_7 = arith.constant 0 : index
    %8 = vector.load %arg8[%c0_6, %c0_7] : memref<128x128xf32, #tpu.memory_space<vmem>>, vector<128x128xf32>
    tpu.vector_store %arg8[%c0_6, %c0_7], %7 {strides = array<i32>} : memref<128x128xf32, #tpu.memory_space<vmem>>, vector<128x128xf32>,
    %c0_i32_8 = arith.constant 0 : i32
    %9 = arith.cmpi eq, %arg2, %c0_i32_8 : i32
    %10 = arith.extui %9 : i1 to i32
    %c0_i32_9 = arith.constant 0 : i32
    %11 = arith.cmpi ne, %10, %c0_i32_9 : i32
    scf.if %11 {
      %c0_10 = arith.constant 0 : index
      %c0_11 = arith.constant 0 : index
      %12 = vector.load %arg8[%c0_10, %c0_11] : memref<128x128xf32, #tpu.memory_space<vmem>>, vector<128x128xf32>
      %c0_12 = arith.constant 0 : index
      %c0_13 = arith.constant 0 : index
      %13 = vector.load %arg5[%c0_12, %c0_13] : memref<1x128xf32, #tpu.memory_space<vmem>>, vector<1x128xf32>
      %14 = vector.broadcast %13 : vector<1x128xf32> to vector<128x128xf32>
      %15 = arith.addf %12, %14 : vector<128x128xf32>
      %c0_14 = arith.constant 0 : index
      %c0_15 = arith.constant 0 : index
      %16 = vector.load %arg6[%c0_14, %c0_15] : memref<128x128xbf16, #tpu.memory_space<vmem>>, vector<128x128xbf16>
      %17 = arith.extf %16 : vector<128x128xbf16> to vector<128x128xf32>
      %18 = arith.addf %15, %17 : vector<128x128xf32>
      %c0_16 = arith.constant 0 : index
      %c0_17 = arith.constant 0 : index
      %19 = vector.load %arg7[%c0_16, %c0_17] : memref<128x128xf32, #tpu.memory_space<vmem>>, vector<128x128xf32>
      tpu.vector_store %arg7[%c0_16, %c0_17], %18 {strides = array<i32>} : memref<128x128xf32, #tpu.memory_space<vmem>>, vector<128x128xf32>,
    } else {
    }
    return
  }
  func.func @transform_0(%arg0: i32, %arg1: i32, %arg2: i32) -> (i32, i32) {
    %c0_i32 = arith.constant 0 : i32
    return %arg0, %arg2 : i32, i32
  }
  func.func @transform_1(%arg0: i32, %arg1: i32, %arg2: i32) -> (i32, i32) {
    %c0_i32 = arith.constant 0 : i32
    return %arg2, %arg1 : i32, i32
  }
  func.func @transform_2(%arg0: i32, %arg1: i32, %arg2: i32) -> (i32, i32) {
    %c0_i32 = arith.constant 0 : i32
    %c0_i32_0 = arith.constant 0 : i32
    return %c0_i32, %arg1 : i32, i32
  }
  func.func @transform_3(%arg0: i32, %arg1: i32, %arg2: i32) -> (i32, i32) {
    %c0_i32 = arith.constant 0 : i32
    return %arg0, %arg1 : i32, i32
  }
  func.func @transform_4(%arg0: i32, %arg1: i32, %arg2: i32) -> (i32, i32) {
    %c0_i32 = arith.constant 0 : i32
    return %arg0, %arg1 : i32, i32
  }
}

</mosaic_0001>

<bundles_post_ra>
// kernel: squeeze.4
= control target key start
LH: loop header
LB: loop body
LE: loop exit
PB: predicated region body
PF: predicated region fallthrough
CT: control target
= control target key end

     0   :  { %s354_s8 = smov 116   ;;  %s355_s9 = smov 120   ;;  %vm7_vm0 = vcmask 31744   ;;  %s653_s0 = inlined_call_operand.vmem [shape: f32[2,128], index: 0, kind: input, shape index: {}]   ;;  %s654_s1 = inlined_call_operand.vmem [shape: f32[2,32,4], index: 1, kind: output, shape index: {}]  }
   0x1   :  { %v4_v0 = vld [vmem:[%s653_s0] sm:$0x3]  ;;  %s353_s0 = smov 124   ;;  %s356_s10 = smov 112  }
   0x2   :  { %5 = vst [vmem:[#allocation0] sm:$0x3] %v4_v0  ;;  %s357_s11 = smov 108   ;;  %s358_s12 = smov 104  }
   0x3   :  { %s359_s13 = smov 100   ;;  %s360_s14 = smov 96  }
   0x4   :  { %s361_s15 = smov 92   ;;  %s362_s16 = smov 88  }
   0x5   :  { %s363_s17 = smov 84   ;;  %s364_s18 = smov 80  }
   0x6   :  { %s365_s19 = smov 76   ;;  %s366_s20 = smov 72  }
   0x7   :  { %s367_s21 = smov 68   ;;  %s368_s22 = smov 64  }
   0x8   :  { %s369_s23 = smov 60   ;;  %s370_s24 = smov 56  }
   0x9   :  { %v11_v1 = vld [vmem:[#allocation0] sm:$0x3]   ;;  %s371_s25 = smov 52   ;;  %s372_s26 = smov 48  }
   0xa   :  { %v27_v2 = vld [vmem:[#allocation0] sm:$0x3]   ;;  %12 = vrot.lane.b32.xlu0 %v11_v1, %s353_s0  ;;  %s373_s27 = smov 44   ;;  %s374_s28 = smov 40  }
   0xb   :  { %28 = vrot.lane.b32.xlu1 %v27_v2, %s354_s8  ;;  %v19_v3 = vld [vmem:[#allocation0] sm:$0x3]   ;;  %s375_s29 = smov 36   ;;  %s376_s30 = smov 32  }
   0xc   :  { %v35_v4 = vld [vmem:[#allocation0] sm:$0x3]   ;;  %s377_s6 = smov 28   ;;  %s378_s7 = smov 24  }
   0xd   :  { %v43_v5 = vld [vmem:[#allocation0] sm:$0x3]   ;;  %s379_s0 = smov 20   ;;  %s380_s8 = smov 16  }
   0xe   :  { %20 = vrot.lane.b32.xlu0 %v19_v3, %s355_s9  ;;  %v51_v6 = vld [vmem:[#allocation0] sm:$0x3]   ;;  %s381_s9 = smov 12  }
   0xf   :  { %36 = vrot.lane.b32.xlu1 %v35_v4, %s356_s10  ;;  %v59_v7 = vld [vmem:[#allocation0] sm:$0x3]   ;;  %s382_s10 = smov 8  }
  0x10   :  { %v67_v8 = vld [vmem:[#allocation0] sm:$0x3]  }
  0x11   :  { %v75_v9 = vld [vmem:[#allocation0] sm:$0x3]  }
  0x12   :  { %44 = vrot.lane.b32.xlu0 %v43_v5, %s357_s11  ;;  %v83_v10 = vld [vmem:[#allocation0] sm:$0x3]   ;;  %s383_s11 = smov 4  }
  0x13   :  { %52 = vrot.lane.b32.xlu1 %v51_v6, %s358_s12  ;;  %v91_v11 = vld [vmem:[#allocation0] sm:$0x3]  }
  0x14   :  { %v99_v12 = vld [vmem:[#allocation0] sm:$0x3]  }
  0x15   :  { %v107_v13 = vld [vmem:[#allocation0] sm:$0x3]  }
  0x16   :  { %60 = vrot.lane.b32.xlu0 %v59_v7, %s359_s13  ;;  %v115_v14 = vld [vmem:[#allocation0] sm:$0x3]  }
  0x17   :  { %68 = vrot.lane.b32.xlu1 %v67_v8, %s360_s14  ;;  %v123_v15 = vld [vmem:[#allocation0] sm:$0x3]  }
  0x18   :  { %v131_v16 = vld [vmem:[#allocation0] sm:$0x3]  }
  0x19   :  { %v139_v17 = vld [vmem:[#allocation0] sm:$0x3]  }
  0x1a   :  { %76 = vrot.lane.b32.xlu0 %v75_v9, %s361_s15  ;;  %v147_v18 = vld [vmem:[#allocation0] sm:$0x3]  }
  0x1b   :  { %84 = vrot.lane.b32.xlu1 %v83_v10, %s362_s16  ;;  %v155_v19 = vld [vmem:[#allocation0] sm:$0x3]  }
  0x1c   :  { %v163_v20 = vld [vmem:[#allocation0] sm:$0x3]  }
  0x1d   :  { %v171_v21 = vld [vmem:[#allocation0] sm:$0x3]  }
  0x1e   :  { %92 = vrot.lane.b32.xlu0 %v91_v11, %s363_s17  ;;  %v179_v22 = vld [vmem:[#allocation0] sm:$0x3]  }
  0x1f   :  { %100 = vrot.lane.b32.xlu1 %v99_v12, %s364_s18  ;;  %v187_v23 = vld [vmem:[#allocation0] sm:$0x3]  }
  0x20   :  { %v195_v24 = vld [vmem:[#allocation0] sm:$0x3]  }
  0x21   :  { %v203_v25 = vld [vmem:[#allocation0] sm:$0x3]  }
  0x22   :  { %108 = vrot.lane.b32.xlu0 %v107_v13, %s365_s19  ;;  %v211_v26 = vld [vmem:[#allocation0] sm:$0x3]  }
  0x23   :  { %116 = vrot.lane.b32.xlu1 %v115_v14, %s366_s20  ;;  %v6_v27 = vld [vmem:[#allocation0] sm:$0x3]  }
  0x24   :  { %8 = vst.msk [vmem:[%s654_s1] sm:$0x1] %vm7_vm0, %v6_v27   ;;  %259 = vst.msk [vmem:[%s654_s1 + $0x1f] sm:$0x2] %vm7_vm0, %v6_v27   ;;  %v219_v28 = vld [vmem:[#allocation0] sm:$0x3]  }
  0x25   :  { %v227_v29 = vld [vmem:[#allocation0] sm:$0x3]  }
  0x26   :  { %124 = vrot.lane.b32.xlu0 %v123_v15, %s367_s21  ;;  %v235_v30 = vld [vmem:[#allocation0] sm:$0x3]  }
  0x27   :  { %132 = vrot.lane.b32.xlu1 %v131_v16, %s368_s22  ;;  %v243_v31 = vld [vmem:[#allocation0] sm:$0x3]  }
  0x28   :  { %v251_v32 = vld [vmem:[#allocation0] sm:$0x3]  }
  0x2a   :  { %140 = vrot.lane.b32.xlu0 %v139_v17, %s369_s23 }
  0x2b   :  { %148 = vrot.lane.b32.xlu1 %v147_v18, %s370_s24 }
  0x2e   :  { %156 = vrot.lane.b32.xlu0 %v155_v19, %s371_s25 }
  0x2f   :  { %164 = vrot.lane.b32.xlu1 %v163_v20, %s372_s26 }
  0x32   :  { %172 = vrot.lane.b32.xlu0 %v171_v21, %s373_s27 }
  0x33   :  { %180 = vrot.lane.b32.xlu1 %v179_v22, %s374_s28 }
  0x36   :  { %188 = vrot.lane.b32.xlu0 %v187_v23, %s375_s29 }
  0x37   :  { %196 = vrot.lane.b32.xlu1 %v195_v24, %s376_s30 }
  0x3a   :  { %204 = vrot.lane.b32.xlu0 %v203_v25, %s377_s6 }
  0x3b   :  { %212 = vrot.lane.b32.xlu1 %v211_v26, %s378_s7 }
  0x3e   :  { %220 = vrot.lane.b32.xlu0 %v219_v28, %s379_s0 }
  0x3f   :  { %228 = vrot.lane.b32.xlu1 %v227_v29, %s380_s8 }
  0x42   :  { %236 = vrot.lane.b32.xlu0 %v235_v30, %s381_s9 }
  0x43   :  { %244 = vrot.lane.b32.xlu1 %v243_v31, %s382_s10 }
  0x46   :  { %252 = vrot.lane.b32.xlu0 %v251_v32, %s383_s11 }
  0x7c   :  { %v13_v33 = vpop.permute.xlu0 %12  }
  0x7d   :  { %v29_v34 = vpop.permute.xlu1 %28   ;;  %260 = vst.msk [vmem:[%s654_s1 + $0x1] sm:$0x1] %vm7_vm0, %v13_v33   ;;  %261 = vst.msk [vmem:[%s654_s1 + $0x20] sm:$0x2] %vm7_vm0, %v13_v33  }
  0x7e   :  { %264 = vst.msk [vmem:[%s654_s1 + $0x3] sm:$0x1] %vm7_vm0, %v29_v34   ;;  %265 = vst.msk [vmem:[%s654_s1 + $0x22] sm:$0x2] %vm7_vm0, %v29_v34  }
  0x80   :  { %v21_v35 = vpop.permute.xlu0 %20  }
  0x81   :  { %v37_v36 = vpop.permute.xlu1 %36   ;;  %262 = vst.msk [vmem:[%s654_s1 + $0x2] sm:$0x1] %vm7_vm0, %v21_v35   ;;  %263 = vst.msk [vmem:[%s654_s1 + $0x21] sm:$0x2] %vm7_vm0, %v21_v35  }
  0x82   :  { %266 = vst.msk [vmem:[%s654_s1 + $0x4] sm:$0x1] %vm7_vm0, %v37_v36   ;;  %267 = vst.msk [vmem:[%s654_s1 + $0x23] sm:$0x2] %vm7_vm0, %v37_v36  }
  0x84   :  { %v45_v37 = vpop.permute.xlu0 %44  }
  0x85   :  { %v53_v38 = vpop.permute.xlu1 %52   ;;  %268 = vst.msk [vmem:[%s654_s1 + $0x5] sm:$0x1] %vm7_vm0, %v45_v37   ;;  %269 = vst.msk [vmem:[%s654_s1 + $0x24] sm:$0x2] %vm7_vm0, %v45_v37  }
  0x86   :  { %270 = vst.msk [vmem:[%s654_s1 + $0x6] sm:$0x1] %vm7_vm0, %v53_v38   ;;  %271 = vst.msk [vmem:[%s654_s1 + $0x25] sm:$0x2] %vm7_vm0, %v53_v38  }
  0x88   :  { %v61_v39 = vpop.permute.xlu0 %60  }
  0x89   :  { %v69_v40 = vpop.permute.xlu1 %68   ;;  %272 = vst.msk [vmem:[%s654_s1 + $0x7] sm:$0x1] %vm7_vm0, %v61_v39   ;;  %273 = vst.msk [vmem:[%s654_s1 + $0x26] sm:$0x2] %vm7_vm0, %v61_v39  }
  0x8a   :  { %274 = vst.msk [vmem:[%s654_s1 + $0x8] sm:$0x1] %vm7_vm0, %v69_v40   ;;  %275 = vst.msk [vmem:[%s654_s1 + $0x27] sm:$0x2] %vm7_vm0, %v69_v40  }
  0x8c   :  { %v77_v41 = vpop.permute.xlu0 %76  }
  0x8d   :  { %v85_v42 = vpop.permute.xlu1 %84   ;;  %276 = vst.msk [vmem:[%s654_s1 + $0x9] sm:$0x1] %vm7_vm0, %v77_v41   ;;  %277 = vst.msk [vmem:[%s654_s1 + $0x28] sm:$0x2] %vm7_vm0, %v77_v41  }
  0x8e   :  { %278 = vst.msk [vmem:[%s654_s1 + $0xa] sm:$0x1] %vm7_vm0, %v85_v42   ;;  %279 = vst.msk [vmem:[%s654_s1 + $0x29] sm:$0x2] %vm7_vm0, %v85_v42  }
  0x90   :  { %v93_v43 = vpop.permute.xlu0 %92  }
  0x91   :  { %v101_v44 = vpop.permute.xlu1 %100   ;;  %280 = vst.msk [vmem:[%s654_s1 + $0xb] sm:$0x1] %vm7_vm0, %v93_v43   ;;  %281 = vst.msk [vmem:[%s654_s1 + $0x2a] sm:$0x2] %vm7_vm0, %v93_v43  }
  0x92   :  { %282 = vst.msk [vmem:[%s654_s1 + $0xc] sm:$0x1] %vm7_vm0, %v101_v44   ;;  %283 = vst.msk [vmem:[%s654_s1 + $0x2b] sm:$0x2] %vm7_vm0, %v101_v44  }
  0x94   :  { %v109_v45 = vpop.permute.xlu0 %108  }
  0x95   :  { %v117_v46 = vpop.permute.xlu1 %116   ;;  %284 = vst.msk [vmem:[%s654_s1 + $0xd] sm:$0x1] %vm7_vm0, %v109_v45   ;;  %285 = vst.msk [vmem:[%s654_s1 + $0x2c] sm:$0x2] %vm7_vm0, %v109_v45  }
  0x96   :  { %286 = vst.msk [vmem:[%s654_s1 + $0xe] sm:$0x1] %vm7_vm0, %v117_v46   ;;  %287 = vst.msk [vmem:[%s654_s1 + $0x2d] sm:$0x2] %vm7_vm0, %v117_v46  }
  0x98   :  { %v125_v47 = vpop.permute.xlu0 %124  }
  0x99   :  { %v133_v48 = vpop.permute.xlu1 %132   ;;  %288 = vst.msk [vmem:[%s654_s1 + $0xf] sm:$0x1] %vm7_vm0, %v125_v47   ;;  %289 = vst.msk [vmem:[%s654_s1 + $0x2e] sm:$0x2] %vm7_vm0, %v125_v47  }
  0x9a   :  { %290 = vst.msk [vmem:[%s654_s1 + $0x10] sm:$0x1] %vm7_vm0, %v133_v48   ;;  %291 = vst.msk [vmem:[%s654_s1 + $0x2f] sm:$0x2] %vm7_vm0, %v133_v48  }
  0x9c   :  { %v141_v49 = vpop.permute.xlu0 %140  }
  0x9d   :  { %v149_v50 = vpop.permute.xlu1 %148   ;;  %292 = vst.msk [vmem:[%s654_s1 + $0x11] sm:$0x1] %vm7_vm0, %v141_v49   ;;  %293 = vst.msk [vmem:[%s654_s1 + $0x30] sm:$0x2] %vm7_vm0, %v141_v49  }
  0x9e   :  { %294 = vst.msk [vmem:[%s654_s1 + $0x12] sm:$0x1] %vm7_vm0, %v149_v50   ;;  %295 = vst.msk [vmem:[%s654_s1 + $0x31] sm:$0x2] %vm7_vm0, %v149_v50  }
  0xa0   :  { %v157_v51 = vpop.permute.xlu0 %156  }
  0xa1   :  { %v165_v52 = vpop.permute.xlu1 %164   ;;  %296 = vst.msk [vmem:[%s654_s1 + $0x13] sm:$0x1] %vm7_vm0, %v157_v51   ;;  %297 = vst.msk [vmem:[%s654_s1 + $0x32] sm:$0x2] %vm7_vm0, %v157_v51  }
  0xa2   :  { %298 = vst.msk [vmem:[%s654_s1 + $0x14] sm:$0x1] %vm7_vm0, %v165_v52   ;;  %299 = vst.msk [vmem:[%s654_s1 + $0x33] sm:$0x2] %vm7_vm0, %v165_v52  }
  0xa4   :  { %v173_v53 = vpop.permute.xlu0 %172  }
  0xa5   :  { %v181_v54 = vpop.permute.xlu1 %180   ;;  %300 = vst.msk [vmem:[%s654_s1 + $0x15] sm:$0x1] %vm7_vm0, %v173_v53   ;;  %301 = vst.msk [vmem:[%s654_s1 + $0x34] sm:$0x2] %vm7_vm0, %v173_v53  }
  0xa6   :  { %302 = vst.msk [vmem:[%s654_s1 + $0x16] sm:$0x1] %vm7_vm0, %v181_v54   ;;  %303 = vst.msk [vmem:[%s654_s1 + $0x35] sm:$0x2] %vm7_vm0, %v181_v54  }
  0xa8   :  { %v189_v55 = vpop.permute.xlu0 %188  }
  0xa9   :  { %v197_v56 = vpop.permute.xlu1 %196   ;;  %304 = vst.msk [vmem:[%s654_s1 + $0x17] sm:$0x1] %vm7_vm0, %v189_v55   ;;  %305 = vst.msk [vmem:[%s654_s1 + $0x36] sm:$0x2] %vm7_vm0, %v189_v55  }
  0xaa   :  { %306 = vst.msk [vmem:[%s654_s1 + $0x18] sm:$0x1] %vm7_vm0, %v197_v56   ;;  %307 = vst.msk [vmem:[%s654_s1 + $0x37] sm:$0x2] %vm7_vm0, %v197_v56  }
  0xac   :  { %v205_v57 = vpop.permute.xlu0 %204  }
  0xad   :  { %v213_v58 = vpop.permute.xlu1 %212   ;;  %308 = vst.msk [vmem:[%s654_s1 + $0x19] sm:$0x1] %vm7_vm0, %v205_v57   ;;  %309 = vst.msk [vmem:[%s654_s1 + $0x38] sm:$0x2] %vm7_vm0, %v205_v57  }
  0xae   :  { %310 = vst.msk [vmem:[%s654_s1 + $0x1a] sm:$0x1] %vm7_vm0, %v213_v58   ;;  %311 = vst.msk [vmem:[%s654_s1 + $0x39] sm:$0x2] %vm7_vm0, %v213_v58  }
  0xb0   :  { %v221_v59 = vpop.permute.xlu0 %220  }
  0xb1   :  { %v229_v60 = vpop.permute.xlu1 %228   ;;  %312 = vst.msk [vmem:[%s654_s1 + $0x1b] sm:$0x1] %vm7_vm0, %v221_v59   ;;  %313 = vst.msk [vmem:[%s654_s1 + $0x3a] sm:$0x2] %vm7_vm0, %v221_v59  }
  0xb2   :  { %314 = vst.msk [vmem:[%s654_s1 + $0x1c] sm:$0x1] %vm7_vm0, %v229_v60   ;;  %315 = vst.msk [vmem:[%s654_s1 + $0x3b] sm:$0x2] %vm7_vm0, %v229_v60  }
  0xb4   :  { %v237_v61 = vpop.permute.xlu0 %236  }
  0xb5   :  { %v245_v62 = vpop.permute.xlu1 %244   ;;  %316 = vst.msk [vmem:[%s654_s1 + $0x1d] sm:$0x1] %vm7_vm0, %v237_v61   ;;  %317 = vst.msk [vmem:[%s654_s1 + $0x3c] sm:$0x2] %vm7_vm0, %v237_v61  }
  0xb6   :  { %318 = vst.msk [vmem:[%s654_s1 + $0x1e] sm:$0x1] %vm7_vm0, %v245_v62   ;;  %319 = vst.msk [vmem:[%s654_s1 + $0x3d] sm:$0x2] %vm7_vm0, %v245_v62  }
  0xb8   :  { %v253_v63 = vpop.permute.xlu0 %252  }
  0xb9   :  { %320 = vst.msk [vmem:[%s654_s1 + $0x1f] sm:$0x1] %vm7_vm0, %v253_v63   ;;  %321 = vst.msk [vmem:[%s654_s1 + $0x3e] sm:$0x2] %vm7_vm0, %v253_v63  }

// kernel: residual_block_forward.7
= control target key start
LH: loop header
LB: loop body
LE: loop exit
PB: predicated region body
PF: predicated region fallthrough
CT: control target
= control target key end

     0   :  { %s292_s6 = smov 0   ;;  %s294_s7 = smov 0   ;;  %s325_s0 = inlined_call_operand.vmem [shape: f32[2,8,128], index: 0, kind: input, shape index: {}]   ;;  %s326_s1 = inlined_call_operand.vmem [shape: f32[2,2,128], index: 1, kind: output, shape index: {}]  }
   0x1   :  { %s296_s8 = smov 0  }
   0x2 LB: > { %s23_s9 = sadd.s32 1, %s275_s7  ;;  %p227_p0 = scmp.ge.s32.totalorder %s279_s8, 1  ;;  %s279_s8 = sphi %s296_s8, %s11_s8   ;;  %s275_s7 = sphi %s294_s7, %s328_s7   ;;  %s271_s6 = sphi %s292_s6, %s327_s6  }
   0x3   : > { %p25_p1 = scmp.ge.s32.totalorder %s23_s9, 2  ;;  %p103_p2 = scmp.lt.s32.totalorder %s279_s8, 3 }
   0x5   : > { %s330_s9 = smov (%p25_p1, %s23_s9), 0  ;;  %p104_p3 = pnand %p227_p0, %p103_p2 }
   0x6   : > { %p124_p4 = scmp.lt.s32.totalorder (!%p104_p3), %s271_s6, 1  ;;  %v281_v0 = vmov (!%p104_p3), 0.0   ;;  %vm155_vm0 = vcmask (!%p104_p3), 1040384  }
   0x7   : > { %107 = sbr.rel (%p104_p3) target bundleno = 36 (0x24), region = 24 }
   0xe   : > { %s332_s6 = smov (!%p124_p4, %s271_s6), 1 }
   0xf   : > { %s228_s10 = sshll.u32 %s332_s6, 3  ;;  %s229_s11 = sshll.u32 %s332_s6, 1 }
  0x10   : > { %s130_s14 = scalar_lea.vmem %s325_s0, %s228_s10  ;;  %s134_s17 = scalar_lea.vmem %s326_s1, %s229_s11 }
  0x11   : > { %139 = vst [vmem:[%s134_s17] sm:$0x3] %v281_v0  ;;  %v140_v1 = vld [vmem:[%s130_s14] sm:$0xff] }
  0x12   : > { %v141_v2 = vrot.slane %v140_v1, 4  ;;  %v147_v3 = vmul.f32 %v140_v1, %v140_v1 }
  0x14   : > { %v142_v4 = vadd.f32 %v141_v2, %v140_v1  ;;  %v148_v5 = vrot.slane %v147_v3, 4 }
  0x16   : > { %v143_v6 = vrot.slane %v142_v4, 2  ;;  %v149_v7 = vadd.f32 %v148_v5, %v147_v3 }
  0x18   : > { %v144_v8 = vadd.f32 %v143_v6, %v142_v4  ;;  %v150_v9 = vrot.slane %v149_v7, 2  ;;  %v154_v15 = vld [vmem:[%s134_s17] sm:$0x3] }
  0x1a   : > { %v145_v10 = vrot.slane %v144_v8, 1  ;;  %v151_v11 = vadd.f32 %v150_v9, %v149_v7 }
  0x1c   : > { %v146_v12 = vadd.f32 %v145_v10, %v144_v8  ;;  %v152_v13 = vrot.slane %v151_v11, 1 }
  0x1e   : > { %v153_v14 = vadd.f32 %v152_v13, %v151_v11 }
  0x20   : > { %v156_v16 = vsel %vm155_vm0, %v146_v12, %v153_v14 }
  0x21   : > { %v157_v17 = vadd.f32 %v156_v16, %v154_v15 }
  0x23   : > { %158 = vst [vmem:[%s134_s17] sm:$0x3] %v157_v17 }
  0x24 PF: > { %s11_s8 = sadd.s32 1, %s279_s8   ;;  %s327_s6 = smov %s275_s7 }
  0x25   : > { %p8_p5 = scmp.ge.s32.totalorder %s11_s8, 4   ;;  %s328_s7 = smov %s330_s9 }
  0x27   :  { %10 = sbr.rel (!%p8_p5) target bundleno = 2 (0x2), region = 58 }

// kernel: residual_block_forward.8
= control target key start
LH: loop header
LB: loop body
LE: loop exit
PB: predicated region body
PF: predicated region fallthrough
CT: control target
= control target key end

     0   :  { %s416_s12 = smov 0   ;;  %s418_s13 = smov 0   ;;  %s448_s0 = inlined_call_operand.vmem [shape: f32[2,8,128], index: 0, kind: input, shape index: {}]   ;;  %s449_s1 = inlined_call_operand.vmem [shape: f32[2,1,128], index: 1, kind: input, shape index: {}]   ;;  %s450_s2 = inlined_call_operand.vmem [shape: f32[2,1,128], index: 2, kind: input, shape index: {}]   ;;  %s451_s3 = inlined_call_operand.vmem [shape: bf16[2,8,128], index: 3, kind: output, shape index: {}]  }
   0x1   :  { %s420_s14 = smov 0  }
   0x2 LB: > { %s25_s15 = sadd.s32 1, %s390_s13  ;;  %p341_p0 = scmp.ge.s32.totalorder %s394_s14, 1  ;;  %s394_s14 = sphi %s420_s14, %s13_s14   ;;  %s390_s13 = sphi %s418_s13, %s453_s13   ;;  %s386_s12 = sphi %s416_s12, %s452_s12  }
   0x3   : > { %p27_p1 = scmp.ge.s32.totalorder %s25_s15, 2  ;;  %p171_p2 = scmp.lt.s32.totalorder %s394_s14, 3 }
   0x5   : > { %s455_s15 = smov (%p27_p1, %s25_s15), 0  ;;  %p172_p3 = pnand %p341_p0, %p171_p2 }
   0x6   : > { %p205_p4 = scmp.lt.s32.totalorder (!%p172_p3), %s386_s12, 1 }
   0x7   : > { %175 = sbr.rel (%p172_p3) target bundleno = 27 (0x1b), region = 32 }
   0xe   : > { %s457_s12 = smov (!%p205_p4, %s386_s12), 1 }
   0xf   : > { %s342_s16 = sshll.u32 %s457_s12, 3  ;;  %s214_s19 = scalar_lea.vmem %s449_s1, %s457_s12 }
  0x10   : > { %s211_s22 = scalar_lea.vmem %s448_s0, %s342_s16  ;;  %s217_s25 = scalar_lea.vmem %s450_s2, %s457_s12  ;;  %v344_v0 = vld [vmem:[%s214_s19] ss:$0 sm:$0xff] }
  0x11   : > { %v225_v1 = vld [vmem:[%s211_s22] sm:$0xff]  ;;  %s343_s26 = sshll.u32 %s457_s12, 2 }
  0x12   : > { %v345_v2 = vld [vmem:[%s217_s25] ss:$0 sm:$0xff]  ;;  %v233_v3 = vmul.f32 %v344_v0, %v225_v1  ;;  %s224_s29 = scalar_lea.vmem %s451_s3, %s343_s26 }
  0x14   : > { %v241_v4 = vadd.f32 %v345_v2, %v233_v3 }
  0x16   : > { %v242_v5 = vmax.f32 %v241_v4, 0.0 }
  0x18   : > { %v243_v6 = vpack.c.bf16 %v242_v5, %v242_v5 }
  0x1a   : > { %244 = vst [vmem:[%s224_s29] sm:$0xf] %v243_v6 }
  0x1b PF: > { %s13_s14 = sadd.s32 1, %s394_s14   ;;  %s452_s12 = smov %s390_s13 }
  0x1c   : > { %p10_p5 = scmp.ge.s32.totalorder %s13_s14, 4   ;;  %s453_s13 = smov %s455_s15 }
  0x1e   :  { %12 = sbr.rel (!%p10_p5) target bundleno = 2 (0x2), region = 68 }

// kernel: residual_block_forward.10
= control target key start
LH: loop header
LB: loop body
LE: loop exit
PB: predicated region body
PF: predicated region fallthrough
CT: control target
= control target key end

     0   :  { %s705_s1 = inlined_call_operand.vmem [shape: bf16[128,128], index: 1, kind: input, shape index: {}]   ;;  %s706_s0 = inlined_call_operand.vmem [shape: bf16[128,128], index: 0, kind: input, shape index: {}]   ;;  %s707_s2 = inlined_call_operand.vmem [shape: f32[1,128], index: 2, kind: input, shape index: {}]   ;;  %s708_s3 = inlined_call_operand.vmem [shape: bf16[128,128], index: 3, kind: output, shape index: {}]  }
   0x1   :  { %v594_v0 = vld [vmem:[%s705_s1] sm:$0xff]   ;;  %v595_v1 = vld [vmem:[%s705_s1 + $0x8] sm:$0xff]   ;;  %v596_v2 = vld [vmem:[%s705_s1 + $0x10] sm:$0xff]  }
   0x2   :  { %546 = vmatprep.subr.bf16.mxu0 %v594_v0  ;;  %578 = vmatprep.subr.bf16.mxu1 %v594_v0  ;;  %v597_v3 = vld [vmem:[%s705_s1 + $0x18] sm:$0xff]   ;;  %v602_v4 = vld [vmem:[%s706_s0] sm:$0xff]   ;;  %v599_v7 = vld [vmem:[%s705_s1 + $0x28] sm:$0xff]  }
   0x3   :  { %547 = vmatpush3.bf16.msra.mxu0 %v594_v0  ;;  %586 = vmatpush3.bf16.msra.mxu1 %v594_v0  ;;  %v603_v5 = vld [vmem:[%s706_s0 + $0x20] sm:$0xff]   ;;  %v600_v8 = vld [vmem:[%s705_s1 + $0x30] sm:$0xff]   ;;  %v601_v9 = vld [vmem:[%s705_s1 + $0x38] sm:$0xff]  }
   0x4   :  { %548 = vmatprep.subr.bf16.mxu0 %v595_v1  ;;  %579 = vmatprep.subr.bf16.mxu1 %v595_v1  ;;  %v598_v6 = vld [vmem:[%s705_s1 + $0x20] sm:$0xff]   ;;  %v604_v10 = vld [vmem:[%s706_s0 + $0x8] sm:$0xff]   ;;  %v606_v12 = vld [vmem:[%s706_s0 + $0x10] sm:$0xff]  }
   0x5   :  { %562 = vmatprep.mubr.bf16.mxu0 %v602_v4  ;;  %570 = vmatprep.mubr.bf16.mxu1 %v603_v5  ;;  %v605_v11 = vld [vmem:[%s706_s0 + $0x28] sm:$0xff]   ;;  %v607_v13 = vld [vmem:[%s706_s0 + $0x30] sm:$0xff]   ;;  %v608_v14 = vld [vmem:[%s706_s0 + $0x18] sm:$0xff]  }
   0x6   :  { %v609_v15 = vld [vmem:[%s706_s0 + $0x38] sm:$0xff]   ;;  %v450_v17 = vld [vmem:[%s707_s2] ss:$0 sm:$0xff] }
   0x7   :  { %549 = vmatpush3.bf16.msra.mxu0 %v595_v1  ;;  %587 = vmatpush3.bf16.msra.mxu1 %v595_v1 }
   0x8   :  { %550 = vmatprep.subr.bf16.mxu0 %v596_v2  ;;  %580 = vmatprep.subr.bf16.mxu1 %v596_v2 }
   0xb   :  { %551 = vmatpush3.bf16.msra.mxu0 %v596_v2  ;;  %588 = vmatpush3.bf16.msra.mxu1 %v596_v2 }
   0xc   :  { %552 = vmatprep.subr.bf16.mxu0 %v597_v3  ;;  %581 = vmatprep.subr.bf16.mxu1 %v597_v3 }
   0xf   :  { %553 = vmatpush3.bf16.msra.mxu0 %v597_v3  ;;  %589 = vmatpush3.bf16.msra.mxu1 %v597_v3 }
  0x10   :  { %554 = vmatprep.subr.bf16.mxu0 %v598_v6  ;;  %582 = vmatprep.subr.bf16.mxu1 %v598_v6 }
  0x13   :  { %555 = vmatpush3.bf16.msra.mxu0 %v598_v6  ;;  %590 = vmatpush3.bf16.msra.mxu1 %v598_v6 }
  0x14   :  { %556 = vmatprep.subr.bf16.mxu0 %v599_v7  ;;  %583 = vmatprep.subr.bf16.mxu1 %v599_v7 }
  0x17   :  { %557 = vmatpush3.bf16.msra.mxu0 %v599_v7  ;;  %591 = vmatpush3.bf16.msra.mxu1 %v599_v7 }
  0x18   :  { %558 = vmatprep.subr.bf16.mxu0 %v600_v8  ;;  %584 = vmatprep.subr.bf16.mxu1 %v600_v8 }
  0x1b   :  { %559 = vmatpush3.bf16.msra.mxu0 %v600_v8  ;;  %592 = vmatpush3.bf16.msra.mxu1 %v600_v8 }
  0x1c   :  { %560 = vmatprep.subr.bf16.mxu0 %v601_v9  ;;  %585 = vmatprep.subr.bf16.mxu1 %v601_v9 }
  0x1f   :  { %561 = vmatpush3.bf16.msra.mxu0 %v601_v9  ;;  %593 = vmatpush3.bf16.msra.mxu1 %v601_v9 }
  0x22   :  { %563 = vmatmul.mubr.bf16.vlgmr.msra.gmra.mrb[0].mxu0 %v604_v10  ;;  %571 = vmatmul.mubr.bf16.vlgmr.msra.gmra.mrb[0].mxu1 %v605_v11 }
  0x23   :  { %566 = vmatprep.mubr.bf16.mxu0 %v606_v12  ;;  %574 = vmatprep.mubr.bf16.mxu1 %v607_v13 }
  0x2a   :  { %567 = vmatmul.mubr.bf16.gmra.mrb[4].mxu0 %v608_v14  ;;  %575 = vmatmul.mubr.bf16.gmra.mrb[4].mxu1 %v609_v15 }
  0xf5   :  { %v564_v16 = vpop.f32.mrb[0].mxu0  ;;  %v572_v18 = vpop.f32.mrb[0].mxu1 }
  0xf6   :  { %v213_v19 = vpop.f32.mrb[1].mxu0  ;;  %v245_v20 = vpop.f32.mrb[1].mxu1  ;;  %v336_v23 = vadd.f32 %v564_v16, %v450_v17  ;;  %v344_v24 = vadd.f32 %v572_v18, %v450_v17 }
  0xf7   :  { %v565_v21 = vpop.f32.mrb[2].mxu0  ;;  %v573_v22 = vpop.f32.mrb[2].mxu1  ;;  %v334_v29 = vadd.f32 %v450_v17, %v213_v19  ;;  %v342_v30 = vadd.f32 %v450_v17, %v245_v20 }
  0xf8   :  { %v337_v25 = vadd.f32 %v565_v21, %v450_v17  ;;  %v345_v26 = vadd.f32 %v573_v22, %v450_v17  ;;  %v216_v27 = vpop.f32.mrb[3].mxu0  ;;  %v248_v28 = vpop.f32.mrb[3].mxu1 }
  0xf9   :  { %v335_v31 = vadd.f32 %v450_v17, %v216_v27  ;;  %v343_v32 = vadd.f32 %v450_v17, %v248_v28 }
  0xfa   :  { %v491_v33 = vpack.c.bf16 %v337_v25, %v336_v23  ;;  %v511_v34 = vpack.c.bf16 %v345_v26, %v344_v24 }
  0xfb   :  { %v486_v35 = vpack.c.bf16 %v335_v31, %v334_v29  ;;  %v506_v36 = vpack.c.bf16 %v343_v32, %v342_v30 }
  0xfc   :  { %523 = vst [vmem:[%s708_s3 + $0x8] sm:$0xff] %v491_v33   ;;  %527 = vst [vmem:[%s708_s3 + $0x28] sm:$0xff] %v511_v34  }
  0xfd   :  { %487 = vst [vmem:[%s708_s3] sm:$0xff] %v486_v35   ;;  %526 = vst [vmem:[%s708_s3 + $0x20] sm:$0xff] %v506_v36   ;;  %v568_v37 = vpop.f32.mrb[4].mxu0  ;;  %v576_v38 = vpop.f32.mrb[4].mxu1 }
  0xfe   :  { %v229_v39 = vpop.f32.mrb[5].mxu0  ;;  %v261_v40 = vpop.f32.mrb[5].mxu1  ;;  %v340_v43 = vadd.f32 %v568_v37, %v450_v17  ;;  %v348_v44 = vadd.f32 %v576_v38, %v450_v17 }
  0xff   :  { %v569_v41 = vpop.f32.mrb[6].mxu0  ;;  %v577_v42 = vpop.f32.mrb[6].mxu1  ;;  %v338_v49 = vadd.f32 %v450_v17, %v229_v39  ;;  %v346_v50 = vadd.f32 %v450_v17, %v261_v40 }
 0x100   :  { %v341_v45 = vadd.f32 %v569_v41, %v450_v17  ;;  %v349_v46 = vadd.f32 %v577_v42, %v450_v17  ;;  %v232_v47 = vpop.f32.mrb[7].mxu0  ;;  %v264_v48 = vpop.f32.mrb[7].mxu1 }
 0x101   :  { %v339_v51 = vadd.f32 %v450_v17, %v232_v47  ;;  %v347_v52 = vadd.f32 %v450_v17, %v264_v48 }
 0x102   :  { %v501_v53 = vpack.c.bf16 %v341_v45, %v340_v43  ;;  %v521_v54 = vpack.c.bf16 %v349_v46, %v348_v44 }
 0x103   :  { %v496_v55 = vpack.c.bf16 %v339_v51, %v338_v49  ;;  %v516_v56 = vpack.c.bf16 %v347_v52, %v346_v50 }
 0x104   :  { %525 = vst [vmem:[%s708_s3 + $0x18] sm:$0xff] %v501_v53   ;;  %529 = vst [vmem:[%s708_s3 + $0x38] sm:$0xff] %v521_v54  }
 0x105   :  { %524 = vst [vmem:[%s708_s3 + $0x10] sm:$0xff] %v496_v55   ;;  %528 = vst [vmem:[%s708_s3 + $0x30] sm:$0xff] %v516_v56  }

// kernel: squeeze.6
= control target key start
LH: loop header
LB: loop body
LE: loop exit
PB: predicated region body
PF: predicated region fallthrough
CT: control target
= control target key end

     0   :  { %s130_s8 = smov 104   ;;  %s131_s9 = smov 112   ;;  %vm7_vm0 = vcmask 64512   ;;  %s221_s0 = inlined_call_operand.vmem [shape: f32[2,128], index: 0, kind: input, shape index: {}]   ;;  %s222_s1 = inlined_call_operand.vmem [shape: f32[2,16,8], index: 1, kind: output, shape index: {}]  }
   0x1   :  { %v4_v0 = vld [vmem:[%s221_s0] sm:$0x3]  ;;  %s129_s0 = smov 120   ;;  %s132_s10 = smov 96  }
   0x2   :  { %5 = vst [vmem:[#allocation0] sm:$0x3] %v4_v0  ;;  %s133_s11 = smov 88   ;;  %s134_s12 = smov 80  }
   0x3   :  { %s135_s13 = smov 72   ;;  %s136_s14 = smov 64  }
   0x4   :  { %s137_s17 = smov 56   ;;  %s138_s18 = smov 48  }
   0x5   :  { %s139_s19 = smov 40   ;;  %s140_s20 = smov 32  }
   0x6   :  { %s141_s21 = smov 24   ;;  %s142_s22 = smov 16  }
   0x7   :  { %s143_s23 = smov 8  }
   0x9   :  { %v9_v1 = vld [vmem:[#allocation0] sm:$0x3]  }
   0xa   :  { %v21_v2 = vld [vmem:[#allocation0] sm:$0x3]   ;;  %10 = vrot.lane.b32.xlu0 %v9_v1, %s129_s0 }
   0xb   :  { %22 = vrot.lane.b32.xlu1 %v21_v2, %s130_s8  ;;  %v15_v3 = vld [vmem:[#allocation0] sm:$0x3]  }
   0xc   :  { %v27_v4 = vld [vmem:[#allocation0] sm:$0x3]  }
   0xd   :  { %v33_v5 = vld [vmem:[#allocation0] sm:$0x3]  }
   0xe   :  { %16 = vrot.lane.b32.xlu0 %v15_v3, %s131_s9  ;;  %v39_v6 = vld [vmem:[#allocation0] sm:$0x3]  }
   0xf   :  { %28 = vrot.lane.b32.xlu1 %v27_v4, %s132_s10  ;;  %v45_v7 = vld [vmem:[#allocation0] sm:$0x3]  }
  0x10   :  { %v51_v8 = vld [vmem:[#allocation0] sm:$0x3]  }
  0x11   :  { %v57_v9 = vld [vmem:[#allocation0] sm:$0x3]  }
  0x12   :  { %34 = vrot.lane.b32.xlu0 %v33_v5, %s133_s11  ;;  %v63_v10 = vld [vmem:[#allocation0] sm:$0x3]  }
  0x13   :  { %40 = vrot.lane.b32.xlu1 %v39_v6, %s134_s12  ;;  %v6_v11 = vld [vmem:[#allocation0] sm:$0x3]  }
  0x14   :  { %8 = vst.msk [vmem:[%s222_s1] ss:$16 sm:$0x3] %vm7_vm0, %v6_v11   ;;  %v69_v12 = vld [vmem:[#allocation0] sm:$0x3]  }
  0x15   :  { %v75_v13 = vld [vmem:[#allocation0] sm:$0x3]  }
  0x16   :  { %46 = vrot.lane.b32.xlu0 %v45_v7, %s135_s13  ;;  %v81_v14 = vld [vmem:[#allocation0] sm:$0x3]  }
  0x17   :  { %52 = vrot.lane.b32.xlu1 %v51_v8, %s136_s14  ;;  %v87_v15 = vld [vmem:[#allocation0] sm:$0x3]  }
  0x18   :  { %v93_v16 = vld [vmem:[#allocation0] sm:$0x3]  }
  0x1a   :  { %58 = vrot.lane.b32.xlu0 %v57_v9, %s137_s17 }
  0x1b   :  { %64 = vrot.lane.b32.xlu1 %v63_v10, %s138_s18 }
  0x1e   :  { %70 = vrot.lane.b32.xlu0 %v69_v12, %s139_s19 }
  0x1f   :  { %76 = vrot.lane.b32.xlu1 %v75_v13, %s140_s20 }
  0x22   :  { %82 = vrot.lane.b32.xlu0 %v81_v14, %s141_s21 }
  0x23   :  { %88 = vrot.lane.b32.xlu1 %v87_v15, %s142_s22 }
  0x26   :  { %94 = vrot.lane.b32.xlu0 %v93_v16, %s143_s23 }
  0x7c   :  { %v11_v17 = vpop.permute.xlu0 %10  }
  0x7d   :  { %v23_v18 = vpop.permute.xlu1 %22   ;;  %99 = vst.msk [vmem:[%s222_s1 + $0x1] ss:$16 sm:$0x3] %vm7_vm0, %v11_v17  }
  0x7e   :  { %101 = vst.msk [vmem:[%s222_s1 + $0x3] ss:$16 sm:$0x3] %vm7_vm0, %v23_v18  }
  0x80   :  { %v17_v19 = vpop.permute.xlu0 %16  }
  0x81   :  { %v29_v20 = vpop.permute.xlu1 %28   ;;  %100 = vst.msk [vmem:[%s222_s1 + $0x2] ss:$16 sm:$0x3] %vm7_vm0, %v17_v19  }
  0x82   :  { %102 = vst.msk [vmem:[%s222_s1 + $0x4] ss:$16 sm:$0x3] %vm7_vm0, %v29_v20  }
  0x84   :  { %v35_v21 = vpop.permute.xlu0 %34  }
  0x85   :  { %v41_v22 = vpop.permute.xlu1 %40   ;;  %103 = vst.msk [vmem:[%s222_s1 + $0x5] ss:$16 sm:$0x3] %vm7_vm0, %v35_v21  }
  0x86   :  { %104 = vst.msk [vmem:[%s222_s1 + $0x6] ss:$16 sm:$0x3] %vm7_vm0, %v41_v22  }
  0x88   :  { %v47_v23 = vpop.permute.xlu0 %46  }
  0x89   :  { %v53_v24 = vpop.permute.xlu1 %52   ;;  %105 = vst.msk [vmem:[%s222_s1 + $0x7] ss:$16 sm:$0x3] %vm7_vm0, %v47_v23  }
  0x8a   :  { %106 = vst.msk [vmem:[%s222_s1 + $0x8] ss:$16 sm:$0x3] %vm7_vm0, %v53_v24  }
  0x8c   :  { %v59_v25 = vpop.permute.xlu0 %58  }
  0x8d   :  { %v65_v26 = vpop.permute.xlu1 %64   ;;  %107 = vst.msk [vmem:[%s222_s1 + $0x9] ss:$16 sm:$0x3] %vm7_vm0, %v59_v25  }
  0x8e   :  { %108 = vst.msk [vmem:[%s222_s1 + $0xa] ss:$16 sm:$0x3] %vm7_vm0, %v65_v26  }
  0x90   :  { %v71_v27 = vpop.permute.xlu0 %70  }
  0x91   :  { %v77_v28 = vpop.permute.xlu1 %76   ;;  %109 = vst.msk [vmem:[%s222_s1 + $0xb] ss:$16 sm:$0x3] %vm7_vm0, %v71_v27  }
  0x92   :  { %110 = vst.msk [vmem:[%s222_s1 + $0xc] ss:$16 sm:$0x3] %vm7_vm0, %v77_v28  }
  0x94   :  { %v83_v29 = vpop.permute.xlu0 %82  }
  0x95   :  { %v89_v30 = vpop.permute.xlu1 %88   ;;  %111 = vst.msk [vmem:[%s222_s1 + $0xd] ss:$16 sm:$0x3] %vm7_vm0, %v83_v29  }
  0x96   :  { %112 = vst.msk [vmem:[%s222_s1 + $0xe] ss:$16 sm:$0x3] %vm7_vm0, %v89_v30  }
  0x98   :  { %v95_v31 = vpop.permute.xlu0 %94  }
  0x99   :  { %113 = vst.msk [vmem:[%s222_s1 + $0xf] ss:$16 sm:$0x3] %vm7_vm0, %v95_v31  }

// kernel: residual_block_forward.11
= control target key start
LH: loop header
LB: loop body
LE: loop exit
PB: predicated region body
PF: predicated region fallthrough
CT: control target
= control target key end

     0   :  { %s296_s6 = smov 0   ;;  %s298_s7 = smov 0   ;;  %s329_s0 = inlined_call_operand.vmem [shape: bf16[2,4,128], index: 0, kind: input, shape index: {}]   ;;  %s330_s1 = inlined_call_operand.vmem [shape: f32[2,2,128], index: 1, kind: output, shape index: {}]  }
   0x1   :  { %s300_s8 = smov 0  }
   0x2 LB: > { %s23_s9 = sadd.s32 1, %s279_s7  ;;  %p231_p0 = scmp.ge.s32.totalorder %s283_s8, 1  ;;  %s283_s8 = sphi %s300_s8, %s11_s8   ;;  %s279_s7 = sphi %s298_s7, %s332_s7   ;;  %s275_s6 = sphi %s296_s6, %s331_s6  }
   0x3   : > { %p25_p1 = scmp.ge.s32.totalorder %s23_s9, 2  ;;  %p103_p2 = scmp.lt.s32.totalorder %s283_s8, 3 }
   0x5   : > { %s334_s9 = smov (%p25_p1, %s23_s9), 0  ;;  %p104_p3 = pnand %p231_p0, %p103_p2 }
   0x6   : > { %p124_p4 = scmp.lt.s32.totalorder (!%p104_p3), %s275_s6, 1  ;;  %v285_v0 = vmov (!%p104_p3), 0.0   ;;  %vm142_vm0 = vcmask (!%p104_p3), 1043456   ;;  %vm159_vm1 = vcmask (!%p104_p3), 1040384  }
   0x7   : > { %107 = sbr.rel (%p104_p3) target bundleno = 39 (0x27), region = 24 }
   0xe   : > { %s336_s6 = smov (!%p124_p4, %s275_s6), 1 }
   0xf   : > { %s232_s10 = sshll.u32 %s336_s6, 1 }
  0x10   : > { %s130_s13 = scalar_lea.vmem %s329_s0, %s232_s10  ;;  %s134_s16 = scalar_lea.vmem %s330_s1, %s232_s10 }
  0x11   : > { %139 = vst [vmem:[%s134_s16] sm:$0x3] %v285_v0  ;;  %v140_v1 = vld [vmem:[%s130_s13] sm:$0x3] }
  0x12   : > { %v141_v2 = vunpack.c.l.bf16 %v140_v1 }
  0x14   : > { %v143_v3 = vsel %vm142_vm0, %v141_v2, 0.0  ;;  %v150_v4 = vmul.f32 %v141_v2, %v141_v2 }
  0x15   : > { %v144_v5 = vrot.slane %v143_v3, 4 }
  0x16   : > { %v151_v6 = vsel %vm142_vm0, %v150_v4, 0.0 }
  0x17   : > { %v145_v7 = vadd.f32 %v144_v5, %v143_v3  ;;  %v152_v8 = vrot.slane %v151_v6, 4 }
  0x18   : > { %v158_v18 = vld [vmem:[%s134_s16] sm:$0x3] }
  0x19   : > { %v146_v9 = vrot.slane %v145_v7, 2  ;;  %v153_v10 = vadd.f32 %v152_v8, %v151_v6 }
  0x1b   : > { %v147_v11 = vadd.f32 %v146_v9, %v145_v7  ;;  %v154_v12 = vrot.slane %v153_v10, 2 }
  0x1d   : > { %v148_v13 = vrot.slane %v147_v11, 1  ;;  %v155_v14 = vadd.f32 %v154_v12, %v153_v10 }
  0x1f   : > { %v149_v15 = vadd.f32 %v148_v13, %v147_v11  ;;  %v156_v16 = vrot.slane %v155_v14, 1 }
  0x21   : > { %v157_v17 = vadd.f32 %v156_v16, %v155_v14 }
  0x23   : > { %v160_v19 = vsel %vm159_vm1, %v149_v15, %v157_v17 }
  0x24   : > { %v161_v20 = vadd.f32 %v160_v19, %v158_v18 }
  0x26   : > { %162 = vst [vmem:[%s134_s16] sm:$0x3] %v161_v20 }
  0x27 PF: > { %s11_s8 = sadd.s32 1, %s283_s8   ;;  %s331_s6 = smov %s279_s7 }
  0x28   : > { %p8_p5 = scmp.ge.s32.totalorder %s11_s8, 4   ;;  %s332_s7 = smov %s334_s9 }
  0x2a   :  { %10 = sbr.rel (!%p8_p5) target bundleno = 2 (0x2), region = 58 }

// kernel: residual_block_forward.12
= control target key start
LH: loop header
LB: loop body
LE: loop exit
PB: predicated region body
PF: predicated region fallthrough
CT: control target
= control target key end

     0   :  { %s417_s12 = smov 0   ;;  %s419_s13 = smov 0   ;;  %s449_s0 = inlined_call_operand.vmem [shape: bf16[2,4,128], index: 0, kind: input, shape index: {}]   ;;  %s450_s1 = inlined_call_operand.vmem [shape: f32[2,1,128], index: 1, kind: input, shape index: {}]   ;;  %s451_s2 = inlined_call_operand.vmem [shape: f32[2,1,128], index: 2, kind: input, shape index: {}]   ;;  %s452_s3 = inlined_call_operand.vmem [shape: bf16[2,4,128], index: 3, kind: output, shape index: {}]  }
   0x1   :  { %s421_s14 = smov 0  }
   0x2 LB: > { %s25_s15 = sadd.s32 1, %s391_s13  ;;  %p342_p0 = scmp.ge.s32.totalorder %s395_s14, 1  ;;  %s395_s14 = sphi %s421_s14, %s13_s14   ;;  %s391_s13 = sphi %s419_s13, %s454_s13   ;;  %s387_s12 = sphi %s417_s12, %s453_s12  }
   0x3   : > { %p27_p1 = scmp.ge.s32.totalorder %s25_s15, 2  ;;  %p171_p2 = scmp.lt.s32.totalorder %s395_s14, 3 }
   0x5   : > { %s456_s15 = smov (%p27_p1, %s25_s15), 0  ;;  %p172_p3 = pnand %p342_p0, %p171_p2 }
   0x6   : > { %p205_p4 = scmp.lt.s32.totalorder (!%p172_p3), %s387_s12, 1 }
   0x7   : > { %175 = sbr.rel (%p172_p3) target bundleno = 29 (0x1d), region = 32 }
   0xe   : > { %s458_s12 = smov (!%p205_p4, %s387_s12), 1 }
   0xf   : > { %s343_s16 = sshll.u32 %s458_s12, 1  ;;  %s214_s19 = scalar_lea.vmem %s450_s1, %s458_s12 }
  0x10   : > { %s211_s22 = scalar_lea.vmem %s449_s0, %s343_s16  ;;  %s217_s25 = scalar_lea.vmem %s451_s2, %s458_s12  ;;  %v345_v1 = vld [vmem:[%s214_s19] ss:$0 sm:$0xff] }
  0x11   : > { %v225_v0 = vld [vmem:[%s211_s22] sm:$0x3]  ;;  %s224_s28 = scalar_lea.vmem %s452_s3, %s343_s16 }
  0x12   : > { %v226_v2 = vunpack.c.l.bf16 %v225_v0  ;;  %v346_v3 = vld [vmem:[%s217_s25] ss:$0 sm:$0xff] }
  0x14   : > { %v234_v4 = vmul.f32 %v345_v1, %v226_v2 }
  0x16   : > { %v242_v5 = vadd.f32 %v346_v3, %v234_v4 }
  0x18   : > { %v243_v6 = vmax.f32 %v242_v5, 0.0 }
  0x1a   : > { %v244_v7 = vpack.c.bf16 %v243_v6, %v243_v6 }
  0x1c   : > { %245 = vst [vmem:[%s224_s28] sm:$0x3] %v244_v7 }
  0x1d PF: > { %s13_s14 = sadd.s32 1, %s395_s14   ;;  %s453_s12 = smov %s391_s13 }
  0x1e   : > { %p10_p5 = scmp.ge.s32.totalorder %s13_s14, 4   ;;  %s454_s13 = smov %s456_s15 }
  0x20   :  { %12 = sbr.rel (!%p10_p5) target bundleno = 2 (0x2), region = 68 }

// kernel: residual_block_forward.13
= control target key start
LH: loop header
LB: loop body
LE: loop exit
PB: predicated region body
PF: predicated region fallthrough
CT: control target
= control target key end

     0   :  { %s723_s1 = inlined_call_operand.vmem [shape: bf16[128,128], index: 1, kind: input, shape index: {}]   ;;  %s724_s0 = inlined_call_operand.vmem [shape: bf16[128,128], index: 0, kind: input, shape index: {}]   ;;  %s725_s3 = inlined_call_operand.vmem [shape: bf16[128,128], index: 3, kind: input, shape index: {}]   ;;  %s726_s2 = inlined_call_operand.vmem [shape: f32[1,128], index: 2, kind: input, shape index: {}]   ;;  %s727_s4 = inlined_call_operand.vmem [shape: f32[128,128], index: 4, kind: output, shape index: {}]  }
   0x1   :  { %v541_v0 = vld [vmem:[%s723_s1] sm:$0xff]   ;;  %v542_v1 = vld [vmem:[%s723_s1 + $0x8] sm:$0xff]   ;;  %v543_v2 = vld [vmem:[%s723_s1 + $0x10] sm:$0xff]  }
   0x2   :  { %493 = vmatprep.subr.bf16.mxu0 %v541_v0  ;;  %525 = vmatprep.subr.bf16.mxu1 %v541_v0  ;;  %v544_v3 = vld [vmem:[%s723_s1 + $0x18] sm:$0xff]   ;;  %v549_v4 = vld [vmem:[%s724_s0] sm:$0xff]   ;;  %v546_v7 = vld [vmem:[%s723_s1 + $0x28] sm:$0xff]  }
   0x3   :  { %494 = vmatpush3.bf16.msra.mxu0 %v541_v0  ;;  %533 = vmatpush3.bf16.msra.mxu1 %v541_v0  ;;  %v550_v5 = vld [vmem:[%s724_s0 + $0x20] sm:$0xff]   ;;  %v547_v8 = vld [vmem:[%s723_s1 + $0x30] sm:$0xff]   ;;  %v548_v9 = vld [vmem:[%s723_s1 + $0x38] sm:$0xff]  }
   0x4   :  { %495 = vmatprep.subr.bf16.mxu0 %v542_v1  ;;  %526 = vmatprep.subr.bf16.mxu1 %v542_v1  ;;  %v545_v6 = vld [vmem:[%s723_s1 + $0x20] sm:$0xff]   ;;  %v551_v10 = vld [vmem:[%s724_s0 + $0x8] sm:$0xff]   ;;  %v553_v12 = vld [vmem:[%s724_s0 + $0x10] sm:$0xff]  }
   0x5   :  { %509 = vmatprep.mubr.bf16.mxu0 %v549_v4  ;;  %517 = vmatprep.mubr.bf16.mxu1 %v550_v5  ;;  %v552_v11 = vld [vmem:[%s724_s0 + $0x28] sm:$0xff]   ;;  %v554_v13 = vld [vmem:[%s724_s0 + $0x30] sm:$0xff]   ;;  %v555_v14 = vld [vmem:[%s724_s0 + $0x18] sm:$0xff]  }
   0x6   :  { %v556_v15 = vld [vmem:[%s724_s0 + $0x38] sm:$0xff]   ;;  %v470_v16 = vld [vmem:[%s725_s3 + $0x8] sm:$0xff]   ;;  %v439_v18 = vld [vmem:[%s725_s3] sm:$0xff]  }
   0x7   :  { %496 = vmatpush3.bf16.msra.mxu0 %v542_v1  ;;  %534 = vmatpush3.bf16.msra.mxu1 %v542_v1  ;;  %v474_v17 = vld [vmem:[%s725_s3 + $0x28] sm:$0xff]   ;;  %v473_v19 = vld [vmem:[%s725_s3 + $0x20] sm:$0xff]   ;;  %v444_v21 = vunpack.c.l.bf16 %v470_v16  ;;  %v440_v25 = vunpack.c.l.bf16 %v439_v18  ;;  %v445_v31 = vunpack.c.h.bf16 %v470_v16  ;;  %v441_v37 = vunpack.c.h.bf16 %v439_v18  ;;  %v472_v49 = vld [vmem:[%s725_s3 + $0x18] sm:$0xff]  }
   0x8   :  { %497 = vmatprep.subr.bf16.mxu0 %v543_v2  ;;  %527 = vmatprep.subr.bf16.mxu1 %v543_v2  ;;  %v645_v20 = vld [vmem:[%s726_s2] ss:$0 sm:$0xff]  ;;  %v460_v22 = vunpack.c.l.bf16 %v474_v17  ;;  %v456_v26 = vunpack.c.l.bf16 %v473_v19  ;;  %v461_v32 = vunpack.c.h.bf16 %v474_v17  ;;  %v457_v38 = vunpack.c.h.bf16 %v473_v19  ;;  %v476_v50 = vld [vmem:[%s725_s3 + $0x38] sm:$0xff]   ;;  %v471_v53 = vld [vmem:[%s725_s3 + $0x10] sm:$0xff]  }
   0x9   :  { %v475_v54 = vld [vmem:[%s725_s3 + $0x30] sm:$0xff]   ;;  %v452_v57 = vunpack.c.l.bf16 %v472_v49  ;;  %v468_v58 = vunpack.c.l.bf16 %v476_v50  ;;  %v448_v61 = vunpack.c.l.bf16 %v471_v53  ;;  %v469_v4 = vunpack.c.h.bf16 %v476_v50 }
   0xa   :  { %v464_v62 = vunpack.c.l.bf16 %v475_v54 }
   0xb   :  { %498 = vmatpush3.bf16.msra.mxu0 %v543_v2  ;;  %535 = vmatpush3.bf16.msra.mxu1 %v543_v2 }
   0xc   :  { %499 = vmatprep.subr.bf16.mxu0 %v544_v3  ;;  %528 = vmatprep.subr.bf16.mxu1 %v544_v3 }
   0xf   :  { %500 = vmatpush3.bf16.msra.mxu0 %v544_v3  ;;  %536 = vmatpush3.bf16.msra.mxu1 %v544_v3  ;;  %v453_v3 = vunpack.c.h.bf16 %v472_v49 }
  0x10   :  { %501 = vmatprep.subr.bf16.mxu0 %v545_v6  ;;  %529 = vmatprep.subr.bf16.mxu1 %v545_v6 }
  0x13   :  { %502 = vmatpush3.bf16.msra.mxu0 %v545_v6  ;;  %537 = vmatpush3.bf16.msra.mxu1 %v545_v6 }
  0x14   :  { %503 = vmatprep.subr.bf16.mxu0 %v546_v7  ;;  %530 = vmatprep.subr.bf16.mxu1 %v546_v7 }
  0x17   :  { %504 = vmatpush3.bf16.msra.mxu0 %v546_v7  ;;  %538 = vmatpush3.bf16.msra.mxu1 %v546_v7 }
  0x18   :  { %505 = vmatprep.subr.bf16.mxu0 %v547_v8  ;;  %531 = vmatprep.subr.bf16.mxu1 %v547_v8 }
  0x1b   :  { %506 = vmatpush3.bf16.msra.mxu0 %v547_v8  ;;  %539 = vmatpush3.bf16.msra.mxu1 %v547_v8 }
  0x1c   :  { %507 = vmatprep.subr.bf16.mxu0 %v548_v9  ;;  %532 = vmatprep.subr.bf16.mxu1 %v548_v9 }
  0x1f   :  { %508 = vmatpush3.bf16.msra.mxu0 %v548_v9  ;;  %540 = vmatpush3.bf16.msra.mxu1 %v548_v9  ;;  %v449_v9 = vunpack.c.h.bf16 %v471_v53 }
  0x22   :  { %510 = vmatmul.mubr.bf16.vlgmr.msra.gmra.mrb[0].mxu0 %v551_v10  ;;  %518 = vmatmul.mubr.bf16.vlgmr.msra.gmra.mrb[0].mxu1 %v552_v11  ;;  %v465_v10 = vunpack.c.h.bf16 %v475_v54 }
  0x23   :  { %513 = vmatprep.mubr.bf16.mxu0 %v553_v12  ;;  %521 = vmatprep.mubr.bf16.mxu1 %v554_v13 }
  0x2a   :  { %514 = vmatmul.mubr.bf16.gmra.mrb[4].mxu0 %v555_v14  ;;  %522 = vmatmul.mubr.bf16.gmra.mrb[4].mxu1 %v556_v15 }
  0xf5   :  { %v511_v23 = vpop.f32.mrb[0].mxu0  ;;  %v519_v24 = vpop.f32.mrb[0].mxu1 }
  0xf6   :  { %v339_v27 = vadd.f32 %v511_v23, %v645_v20  ;;  %v347_v28 = vadd.f32 %v519_v24, %v645_v20  ;;  %v216_v29 = vpop.f32.mrb[1].mxu0  ;;  %v248_v30 = vpop.f32.mrb[1].mxu1 }
  0xf7   :  { %v337_v33 = vadd.f32 %v645_v20, %v216_v29  ;;  %v345_v34 = vadd.f32 %v645_v20, %v248_v30  ;;  %v512_v35 = vpop.f32.mrb[2].mxu0  ;;  %v520_v36 = vpop.f32.mrb[2].mxu1 }
  0xf8   :  { %v387_v39 = vadd.f32 %v444_v21, %v339_v27  ;;  %v395_v40 = vadd.f32 %v460_v22, %v347_v28  ;;  %v340_v41 = vadd.f32 %v512_v35, %v645_v20  ;;  %v348_v42 = vadd.f32 %v520_v36, %v645_v20  ;;  %v219_v43 = vpop.f32.mrb[3].mxu0  ;;  %v251_v44 = vpop.f32.mrb[3].mxu1 }
  0xf9   :  { %v385_v45 = vadd.f32 %v440_v25, %v337_v33  ;;  %v393_v46 = vadd.f32 %v456_v26, %v345_v34  ;;  %v338_v47 = vadd.f32 %v645_v20, %v219_v43  ;;  %v346_v48 = vadd.f32 %v645_v20, %v251_v44 }
  0xfa   :  { %403 = vst [vmem:[%s727_s4 + $0x10] sm:$0xff] %v387_v39  ;;  %411 = vst [vmem:[%s727_s4 + $0x50] sm:$0xff] %v395_v40  ;;  %v388_v51 = vadd.f32 %v445_v31, %v340_v41  ;;  %v396_v52 = vadd.f32 %v461_v32, %v348_v42 }
  0xfb   :  { %401 = vst [vmem:[%s727_s4] sm:$0xff] %v385_v45  ;;  %409 = vst [vmem:[%s727_s4 + $0x40] sm:$0xff] %v393_v46  ;;  %v386_v55 = vadd.f32 %v441_v37, %v338_v47  ;;  %v394_v56 = vadd.f32 %v457_v38, %v346_v48 }
  0xfc   :  { %404 = vst [vmem:[%s727_s4 + $0x18] sm:$0xff] %v388_v51  ;;  %412 = vst [vmem:[%s727_s4 + $0x58] sm:$0xff] %v396_v52 }
  0xfd   :  { %402 = vst [vmem:[%s727_s4 + $0x8] sm:$0xff] %v386_v55  ;;  %410 = vst [vmem:[%s727_s4 + $0x48] sm:$0xff] %v394_v56  ;;  %v515_v59 = vpop.f32.mrb[4].mxu0  ;;  %v523_v60 = vpop.f32.mrb[4].mxu1 }
  0xfe   :  { %v343_v63 = vadd.f32 %v515_v59, %v645_v20  ;;  %v351_v0 = vadd.f32 %v523_v60, %v645_v20  ;;  %v232_v1 = vpop.f32.mrb[5].mxu0  ;;  %v264_v2 = vpop.f32.mrb[5].mxu1 }
  0xff   :  { %v341_v5 = vadd.f32 %v645_v20, %v232_v1  ;;  %v349_v6 = vadd.f32 %v645_v20, %v264_v2  ;;  %v516_v7 = vpop.f32.mrb[6].mxu0  ;;  %v524_v8 = vpop.f32.mrb[6].mxu1 }
 0x100   :  { %v391_v11 = vadd.f32 %v452_v57, %v343_v63  ;;  %v399_v12 = vadd.f32 %v468_v58, %v351_v0  ;;  %v344_v13 = vadd.f32 %v516_v7, %v645_v20  ;;  %v352_v14 = vadd.f32 %v524_v8, %v645_v20  ;;  %v235_v15 = vpop.f32.mrb[7].mxu0  ;;  %v267_v16 = vpop.f32.mrb[7].mxu1 }
 0x101   :  { %v389_v17 = vadd.f32 %v448_v61, %v341_v5  ;;  %v397_v18 = vadd.f32 %v464_v62, %v349_v6  ;;  %v342_v19 = vadd.f32 %v645_v20, %v235_v15  ;;  %v350_v21 = vadd.f32 %v645_v20, %v267_v16 }
 0x102   :  { %407 = vst [vmem:[%s727_s4 + $0x30] sm:$0xff] %v391_v11  ;;  %415 = vst [vmem:[%s727_s4 + $0x70] sm:$0xff] %v399_v12  ;;  %v392_v22 = vadd.f32 %v453_v3, %v344_v13  ;;  %v400_v23 = vadd.f32 %v469_v4, %v352_v14 }
 0x103   :  { %405 = vst [vmem:[%s727_s4 + $0x20] sm:$0xff] %v389_v17  ;;  %413 = vst [vmem:[%s727_s4 + $0x60] sm:$0xff] %v397_v18  ;;  %v390_v24 = vadd.f32 %v449_v9, %v342_v19  ;;  %v398_v20 = vadd.f32 %v465_v10, %v350_v21 }
 0x104   :  { %408 = vst [vmem:[%s727_s4 + $0x38] sm:$0xff] %v392_v22  ;;  %416 = vst [vmem:[%s727_s4 + $0x78] sm:$0xff] %v400_v23 }
 0x105   :  { %406 = vst [vmem:[%s727_s4 + $0x28] sm:$0xff] %v390_v24  ;;  %414 = vst [vmem:[%s727_s4 + $0x68] sm:$0xff] %v398_v20 }

</bundles_post_ra>
